<compile_context>
chip_gen: v5e
topology: v5e:2x2
jax: 0.10.0
libtpu: 0.0.40
codegen_flags: <defaults>
</compile_context>

<pallas_src>
import numpy as np
import jax
import jax.numpy as jnp
from jax import lax
from jax.experimental import pallas as pl
from jax.experimental.pallas import tpu as pltpu

NEG_SLOPE = 0.01          # torch leaky_relu default negative_slope

# Max batch rows per grid step.  Multiple of 16 (bf16 sublane packing).  At the
# demo channel counts the double-buffered per-step footprint at TB=256 is
# ~7 MiB (f blocks + per-key output blocks) + ~50 KiB resident rf/w, well under
# the 32 MiB scoped default and v7x's 64 MiB physical VMEM.  Shrink if
# Ctot*Ntot grows.
_MAX_TB = 256


# --------------------------------------------------------------------------
# Pallas kernel: one batch tile, all levels, all ROI keys.
# --------------------------------------------------------------------------
def _make_gamma_kernel(chans, pvals, nvs):
    """refs = f_1..f_L   (C_i, TB, P_i) bf16   (blocked on batch, channel-major)
              rf_1..rf_L (P_i, Ntot)   bf16   (resident; ROI keys stacked on N)
              w_1..w_L   (C_i, Ntot)   f32    (resident)
              out_1..out_K (TB, Ctot, Nv_k) f32 (blocked on batch)."""
    L, K = len(chans), len(nvs)

    def kernel(*refs):
        f_refs = refs[:L]
        rf_refs = refs[L:2 * L]
        w_refs = refs[2 * L:3 * L]
        out_refs = refs[3 * L:3 * L + K]

        c_base = 0
        for i in range(L):
            rf = rf_refs[i][...]                       # (P_i, Ntot) bf16, stays in VMEM
            for c in range(chans[i]):                  # static unroll, Ctot small
                fc = f_refs[i][c]                      # (TB, P_i) bf16, contiguous tile
                # MXU: (TB, P_i) @ (P_i, Ntot) with f32 accumulation.
                g = jnp.dot(fc, rf, preferred_element_type=jnp.float32)
                # In-kernel w broadcast: one f32 row scales all TB batch rows.
                g = g * w_refs[i][c:c + 1, :]
                # Scatter the N-stacked result into the per-ROI-key outputs
                # (lane slices at the Nv offsets; channel row c of the output).
                n0 = 0
                for k in range(K):
                    out_refs[k][:, c_base + c, :] = g[:, n0:n0 + nvs[k]]
                    n0 += nvs[k]
            c_base += chans[i]

    return kernel


def gamma_fused(f_list, rf_list, w_list, nvs, *, tb=None):
    """f_list[i]:  (C_i, B, P_i) bf16
       rf_list[i]: (P_i, Ntot)   bf16  (leaky_relu already applied)
       w_list[i]:  (C_i, Ntot)   f32
       returns list of (B, Ctot, Nv_k) f32, one per ROI key."""
    L = len(f_list)
    chans = [int(f.shape[0]) for f in f_list]
    B = int(f_list[0].shape[1])
    pvals = [int(f.shape[2]) for f in f_list]
    Ctot = sum(chans)
    Ntot = sum(nvs)

    if tb is None:
        tb = B if B <= _MAX_TB else _MAX_TB
    if tb != B:
        assert tb % 16 == 0, "batch tile must be a multiple of 16 (bf16 sublane packing)"
    grid = (pl.cdiv(B, tb),)

    in_specs = (
        # feature maps: blocked on the batch (middle) axis
        [pl.BlockSpec((c, tb, p), lambda b: (0, b, 0)) for c, p in zip(chans, pvals)]
        # rf / w: constant index_map -> resident in VMEM across grid steps
        + [pl.BlockSpec((p, Ntot), lambda b: (0, 0)) for p in pvals]
        + [pl.BlockSpec((c, Ntot), lambda b: (0, 0)) for c in chans]
    )
    out_specs = [pl.BlockSpec((tb, Ctot, nv), lambda b: (b, 0, 0)) for nv in nvs]
    out_shape = [jax.ShapeDtypeStruct((B, Ctot, nv), jnp.float32) for nv in nvs]

    cost = pl.CostEstimate(
        flops=2 * B * sum(c * p for c, p in zip(chans, pvals)) * Ntot,
        transcendentals=0,
        bytes_accessed=(2 * sum(B * c * p for c, p in zip(chans, pvals))   # f bf16
                        + 2 * sum(p * Ntot for p in pvals)                 # rf bf16
                        + 4 * sum(c * Ntot for c in chans)                 # w f32
                        + 4 * B * Ctot * Ntot))                            # out f32

    return pl.pallas_call(
        _make_gamma_kernel(tuple(chans), tuple(pvals), tuple(nvs)),
        grid=grid,
        in_specs=in_specs,
        out_specs=out_specs,
        out_shape=out_shape,
        compiler_params=pltpu.CompilerParams(
            # batch-tile axis is independent -> shard across TCs on v7x megacore
            dimension_semantics=("parallel",)),
        cost_estimate=cost,
    )(*f_list, *rf_list, *w_list)


# --------------------------------------------------------------------------
# Glue: a tiny deterministic "simple_model" (fmaps_fn + rf + w parameters).
# The feature-map extractor belongs to the wrapped model, so it stays plain JAX.
# --------------------------------------------------------------------------
def make_params(key, in_ch=3, chans=(4, 8), v_total=160):
    ks = jax.random.split(key, 6)
    conv_ws = []
    c_prev = in_ch
    for i, c in enumerate(chans):
        conv_ws.append(0.1 * jax.random.normal(ks[i], (c, c_prev, 3, 3), jnp.float32))
        c_prev = c
    # spatial sizes after two stride-2 SAME convs on a 16x16 image: 8x8, 4x4
    spatial = [(8, 8), (4, 4)]
    rf = [0.5 * jax.random.normal(ks[2 + i], (h, w, v_total), jnp.float32)
          for i, (h, w) in enumerate(spatial)]
    w = [0.5 * jax.random.normal(ks[4 + i], (chans[i], v_total), jnp.float32)
         for i in range(len(chans))]
    return {"conv": conv_ws, "rf": rf, "w": w}


def fmaps_fn(x, params):
    """model._fmaps_fn: two stride-2 convs with ReLU, NCHW layout."""
    fmaps = []
    h = x
    for w in params["conv"]:
        h = lax.conv_general_dilated(
            h, w, window_strides=(2, 2), padding="SAME",
            dimension_numbers=("NCHW", "OIHW", "NCHW"))
        h = jnp.maximum(h, 0.0)
        fmaps.append(h)
    return fmaps


def simple_model_terms_forward(x, roi_dict, params, tb=None):
    """Mirrors simple_model_terms.forward.
    # TODO(synk): the original boolean roi with data-dependent Nv=roi.sum() has no
    # static-shape equivalent; roi is passed as static index arrays instead."""
    _fmaps = fmaps_fn(x, params)
    B = x.shape[0]
    chans = [int(f.shape[1]) for f in _fmaps]
    pvals = [int(f.shape[2] * f.shape[3]) for f in _fmaps]
    keys = list(roi_dict.keys())
    nvs = [int(roi_dict[k].shape[0]) for k in keys]

    # LHS per level: (C_i, B, P_i) bf16, channel-major so the kernel slices whole
    # contiguous (TB, P_i) tiles off the leading dim (no block-diagonal zeros).
    f_list = [jnp.transpose(f.reshape(B, c, p), (1, 0, 2)).astype(jnp.bfloat16)
              for f, c, p in zip(_fmaps, chans, pvals)]

    # RHS per level with ALL ROI keys stacked along N (single pallas_call, single
    # read of the feature maps, MXU N >= 256); leaky_relu is batch-invariant and
    # hoisted out of the kernel (f32 math, then cast to bf16).
    rf_list, w_list = [], []
    for i, (c, p) in enumerate(zip(chans, pvals)):
        rf = jnp.concatenate(
            [params["rf"][i][:, :, roi_dict[k]].reshape(p, -1) for k in keys], axis=1)
        rf = jnp.where(rf >= 0, rf, NEG_SLOPE * rf).astype(jnp.bfloat16)
        rf_list.append(rf)                                                 # (P_i, Ntot)
        w_list.append(jnp.concatenate(
            [params["w"][i][:, roi_dict[k]] for k in keys], axis=1))       # (C_i, Ntot) f32

    outs = gamma_fused(f_list, rf_list, w_list, nvs, tb=tb)
    return dict(zip(keys, outs))


def _reference_forward(x, roi_dict, params, matmul_dtype=jnp.float32):
    """Pure-JAX reference.  matmul_dtype=bfloat16 mirrors the kernel numerics;
    float32 is the original module's math."""
    _fmaps = fmaps_fn(x, params)
    out_dic = {}
    for key, roi_idx in roi_dict.items():
        out = []
        for i, fmap in enumerate(_fmaps):
            B, C, H, W = fmap.shape
            rf_sel = params["rf"][i][:, :, roi_idx].reshape(H * W, -1)
            rf_sel = jnp.where(rf_sel >= 0, rf_sel, NEG_SLOPE * rf_sel)
            g = jnp.einsum("bcp,pv->bcv",
                           fmap.reshape(B, C, H * W).astype(matmul_dtype),
                           rf_sel.astype(matmul_dtype),
                           preferred_element_type=jnp.float32)
            out.append(g * params["w"][i][:, roi_idx][None])
        out_dic[key] = jnp.concatenate(out, axis=1)
    return out_dic


if __name__ == "__main__":
    key = jax.random.PRNGKey(0)
    k_x, k_p = jax.random.split(key)

    # Input image: batch=32, channels=3, 16x16 spatial (NCHW).  (Small, but big
    # enough that tb=16 gives a 2-step grid and exercises the pipelined path.
    # Real perf wins only show at large B / many ROI keys.)
    B = 32
    x = jax.random.normal(k_x, (B, 3, 16, 16), jnp.float32)
    params = make_params(k_p, in_ch=3, chans=(4, 8), v_total=160)

    # Two deterministic ROIs over 160 voxels, 128 selected each, as static index
    # arrays (Nv must be static under jit/Pallas).  Stacked along N -> Ntot=256.
    roi0 = np.nonzero(np.arange(160) % 5 != 0)[0]
    roi1 = np.nonzero(np.arange(160) % 5 != 1)[0]
    roi_dict = {"roi0": jnp.asarray(roi0, jnp.int32),
                "roi1": jnp.asarray(roi1, jnp.int32)}

    fwd = jax.jit(lambda xx: simple_model_terms_forward(xx, roi_dict, params, tb=16))
    out = fwd(x)
    out = jax.tree_util.tree_map(jax.block_until_ready, out)

    ref_bf16 = _reference_forward(x, roi_dict, params, matmul_dtype=jnp.bfloat16)
    ref_f32 = _reference_forward(x, roi_dict, params, matmul_dtype=jnp.float32)
    for k in out:
        assert out[k].shape == (B, 12, 128), out[k].shape
        # kernel vs numerics-matched reference (bf16 operands, f32 accumulation)
        assert jnp.allclose(out[k], ref_bf16[k], atol=1e-3, rtol=1e-3), \
            float(jnp.max(jnp.abs(out[k] - ref_bf16[k])))
        # semantic sanity vs the original module's full-f32 math
        assert jnp.allclose(out[k], ref_f32[k], atol=1e-1, rtol=1e-1), \
            float(jnp.max(jnp.abs(out[k] - ref_f32[k])))

    print("KERNEL_OK")
</pallas_src>

<mosaic_0001>
module attributes {stable_mosaic.version = 11 : i64} {
  func.func @kernel(%arg0: i32, %arg1: memref<4x16x64xbf16, #tpu.memory_space<vmem>>, %arg2: memref<8x16x16xbf16, #tpu.memory_space<vmem>>, %arg3: memref<64x256xbf16, #tpu.memory_space<vmem>>, %arg4: memref<16x256xbf16, #tpu.memory_space<vmem>>, %arg5: memref<4x256xf32, #tpu.memory_space<vmem>>, %arg6: memref<8x256xf32, #tpu.memory_space<vmem>>, %arg7: memref<16x12x128xf32, #tpu.memory_space<vmem>>, %arg8: memref<16x12x128xf32, #tpu.memory_space<vmem>>) attributes {dimension_semantics = [#tpu.dimension_semantics<parallel>], iteration_bounds = array<i64: 2>, scalar_prefetch = 0 : i64, scratch_operands = 0 : i64, tpu.core_type = #tpu.core_type<tc>, window_params = [{transform_indices = @transform_0, window_bounds = array<i64: 4, 16, 64>}, {transform_indices = @transform_1, window_bounds = array<i64: 8, 16, 16>}, {pipeline_mode = #tpu.pipeline_mode<synchronous>, transform_indices = @transform_2, window_bounds = array<i64: 64, 256>}, {pipeline_mode = #tpu.pipeline_mode<synchronous>, transform_indices = @transform_3, window_bounds = array<i64: 16, 256>}, {pipeline_mode = #tpu.pipeline_mode<synchronous>, transform_indices = @transform_4, window_bounds = array<i64: 4, 256>}, {pipeline_mode = #tpu.pipeline_mode<synchronous>, transform_indices = @transform_5, window_bounds = array<i64: 8, 256>}, {transform_indices = @transform_6, window_bounds = array<i64: 16, 12, 128>}, {transform_indices = @transform_7, window_bounds = array<i64: 16, 12, 128>}]} {
    %c0 = arith.constant 0 : index
    %c0_0 = arith.constant 0 : index
    %0 = vector.load %arg3[%c0, %c0_0] : memref<64x256xbf16, #tpu.memory_space<vmem>>, vector<64x256xbf16>
    %c0_1 = arith.constant 0 : index
    %c0_2 = arith.constant 0 : index
    %c0_3 = arith.constant 0 : index
    %1 = vector.load %arg1[%c0_1, %c0_2, %c0_3] : memref<4x16x64xbf16, #tpu.memory_space<vmem>>, vector<1x16x64xbf16>
    %2 = vector.shape_cast %1 : vector<1x16x64xbf16> to vector<16x64xbf16>
    %cst = arith.constant dense<0.000000e+00> : vector<16x256xf32>
    %3 = tpu.matmul %2, %0, %cst {dimension_numbers = #tpu.dot_dimension_numbers<[1], [0], [0], [1], [0, 0, 1, 1], [], []>} : vector<16x64xbf16>, vector<64x256xbf16>, vector<16x256xf32> -> vector<16x256xf32>
    %c0_4 = arith.constant 0 : index
    %c0_5 = arith.constant 0 : index
    %4 = vector.load %arg5[%c0_4, %c0_5] : memref<4x256xf32, #tpu.memory_space<vmem>>, vector<1x256xf32>
    %5 = vector.broadcast %4 : vector<1x256xf32> to vector<16x256xf32>
    %6 = arith.mulf %3, %5 : vector<16x256xf32>
    %7 = vector.extract_strided_slice %6 {offsets = [0, 0], sizes = [16, 128], strides = [1, 1]} : vector<16x256xf32> to vector<16x128xf32>
    %c0_6 = arith.constant 0 : index
    %c0_7 = arith.constant 0 : index
    %c0_8 = arith.constant 0 : index
    %8 = vector.load %arg7[%c0_6, %c0_7, %c0_8] : memref<16x12x128xf32, #tpu.memory_space<vmem>>, vector<16x1x128xf32>
    %9 = vector.shape_cast %8 : vector<16x1x128xf32> to vector<16x128xf32>
    %10 = vector.shape_cast %7 : vector<16x128xf32> to vector<16x1x128xf32>
    tpu.vector_store %arg7[%c0_6, %c0_7, %c0_8], %10 {strides = array<i32>} : memref<16x12x128xf32, #tpu.memory_space<vmem>>, vector<16x1x128xf32>,
    %11 = vector.extract_strided_slice %6 {offsets = [0, 128], sizes = [16, 128], strides = [1, 1]} : vector<16x256xf32> to vector<16x128xf32>
    %c0_9 = arith.constant 0 : index
    %c0_10 = arith.constant 0 : index
    %c0_11 = arith.constant 0 : index
    %12 = vector.load %arg8[%c0_9, %c0_10, %c0_11] : memref<16x12x128xf32, #tpu.memory_space<vmem>>, vector<16x1x128xf32>
    %13 = vector.shape_cast %12 : vector<16x1x128xf32> to vector<16x128xf32>
    %14 = vector.shape_cast %11 : vector<16x128xf32> to vector<16x1x128xf32>
    tpu.vector_store %arg8[%c0_9, %c0_10, %c0_11], %14 {strides = array<i32>} : memref<16x12x128xf32, #tpu.memory_space<vmem>>, vector<16x1x128xf32>,
    %c1 = arith.constant 1 : index
    %c0_12 = arith.constant 0 : index
    %c0_13 = arith.constant 0 : index
    %15 = vector.load %arg1[%c1, %c0_12, %c0_13] : memref<4x16x64xbf16, #tpu.memory_space<vmem>>, vector<1x16x64xbf16>
    %16 = vector.shape_cast %15 : vector<1x16x64xbf16> to vector<16x64xbf16>
    %cst_14 = arith.constant dense<0.000000e+00> : vector<16x256xf32>
    %17 = tpu.matmul %16, %0, %cst_14 {dimension_numbers = #tpu.dot_dimension_numbers<[1], [0], [0], [1], [0, 0, 1, 1], [], []>} : vector<16x64xbf16>, vector<64x256xbf16>, vector<16x256xf32> -> vector<16x256xf32>
    %c1_15 = arith.constant 1 : index
    %c0_16 = arith.constant 0 : index
    %18 = vector.load %arg5[%c1_15, %c0_16] : memref<4x256xf32, #tpu.memory_space<vmem>>, vector<1x256xf32>
    %19 = vector.broadcast %18 : vector<1x256xf32> to vector<16x256xf32>
    %20 = arith.mulf %17, %19 : vector<16x256xf32>
    %21 = vector.extract_strided_slice %20 {offsets = [0, 0], sizes = [16, 128], strides = [1, 1]} : vector<16x256xf32> to vector<16x128xf32>
    %c0_17 = arith.constant 0 : index
    %c1_18 = arith.constant 1 : index
    %c0_19 = arith.constant 0 : index
    %22 = vector.load %arg7[%c0_17, %c1_18, %c0_19] : memref<16x12x128xf32, #tpu.memory_space<vmem>>, vector<16x1x128xf32>
    %23 = vector.shape_cast %22 : vector<16x1x128xf32> to vector<16x128xf32>
    %24 = vector.shape_cast %21 : vector<16x128xf32> to vector<16x1x128xf32>
    tpu.vector_store %arg7[%c0_17, %c1_18, %c0_19], %24 {strides = array<i32>} : memref<16x12x128xf32, #tpu.memory_space<vmem>>, vector<16x1x128xf32>,
    %25 = vector.extract_strided_slice %20 {offsets = [0, 128], sizes = [16, 128], strides = [1, 1]} : vector<16x256xf32> to vector<16x128xf32>
    %c0_20 = arith.constant 0 : index
    %c1_21 = arith.constant 1 : index
    %c0_22 = arith.constant 0 : index
    %26 = vector.load %arg8[%c0_20, %c1_21, %c0_22] : memref<16x12x128xf32, #tpu.memory_space<vmem>>, vector<16x1x128xf32>
    %27 = vector.shape_cast %26 : vector<16x1x128xf32> to vector<16x128xf32>
    %28 = vector.shape_cast %25 : vector<16x128xf32> to vector<16x1x128xf32>
    tpu.vector_store %arg8[%c0_20, %c1_21, %c0_22], %28 {strides = array<i32>} : memref<16x12x128xf32, #tpu.memory_space<vmem>>, vector<16x1x128xf32>,
    %c2 = arith.constant 2 : index
    %c0_23 = arith.constant 0 : index
    %c0_24 = arith.constant 0 : index
    %29 = vector.load %arg1[%c2, %c0_23, %c0_24] : memref<4x16x64xbf16, #tpu.memory_space<vmem>>, vector<1x16x64xbf16>
    %30 = vector.shape_cast %29 : vector<1x16x64xbf16> to vector<16x64xbf16>
    %cst_25 = arith.constant dense<0.000000e+00> : vector<16x256xf32>
    %31 = tpu.matmul %30, %0, %cst_25 {dimension_numbers = #tpu.dot_dimension_numbers<[1], [0], [0], [1], [0, 0, 1, 1], [], []>} : vector<16x64xbf16>, vector<64x256xbf16>, vector<16x256xf32> -> vector<16x256xf32>
    %c2_26 = arith.constant 2 : index
    %c0_27 = arith.constant 0 : index
    %32 = vector.load %arg5[%c2_26, %c0_27] : memref<4x256xf32, #tpu.memory_space<vmem>>, vector<1x256xf32>
    %33 = vector.broadcast %32 : vector<1x256xf32> to vector<16x256xf32>
    %34 = arith.mulf %31, %33 : vector<16x256xf32>
    %35 = vector.extract_strided_slice %34 {offsets = [0, 0], sizes = [16, 128], strides = [1, 1]} : vector<16x256xf32> to vector<16x128xf32>
    %c0_28 = arith.constant 0 : index
    %c2_29 = arith.constant 2 : index
    %c0_30 = arith.constant 0 : index
    %36 = vector.load %arg7[%c0_28, %c2_29, %c0_30] : memref<16x12x128xf32, #tpu.memory_space<vmem>>, vector<16x1x128xf32>
    %37 = vector.shape_cast %36 : vector<16x1x128xf32> to vector<16x128xf32>
    %38 = vector.shape_cast %35 : vector<16x128xf32> to vector<16x1x128xf32>
    tpu.vector_store %arg7[%c0_28, %c2_29, %c0_30], %38 {strides = array<i32>} : memref<16x12x128xf32, #tpu.memory_space<vmem>>, vector<16x1x128xf32>,
    %39 = vector.extract_strided_slice %34 {offsets = [0, 128], sizes = [16, 128], strides = [1, 1]} : vector<16x256xf32> to vector<16x128xf32>
    %c0_31 = arith.constant 0 : index
    %c2_32 = arith.constant 2 : index
    %c0_33 = arith.constant 0 : index
    %40 = vector.load %arg8[%c0_31, %c2_32, %c0_33] : memref<16x12x128xf32, #tpu.memory_space<vmem>>, vector<16x1x128xf32>
    %41 = vector.shape_cast %40 : vector<16x1x128xf32> to vector<16x128xf32>
    %42 = vector.shape_cast %39 : vector<16x128xf32> to vector<16x1x128xf32>
    tpu.vector_store %arg8[%c0_31, %c2_32, %c0_33], %42 {strides = array<i32>} : memref<16x12x128xf32, #tpu.memory_space<vmem>>, vector<16x1x128xf32>,
    %c3 = arith.constant 3 : index
    %c0_34 = arith.constant 0 : index
    %c0_35 = arith.constant 0 : index
    %43 = vector.load %arg1[%c3, %c0_34, %c0_35] : memref<4x16x64xbf16, #tpu.memory_space<vmem>>, vector<1x16x64xbf16>
    %44 = vector.shape_cast %43 : vector<1x16x64xbf16> to vector<16x64xbf16>
    %cst_36 = arith.constant dense<0.000000e+00> : vector<16x256xf32>
    %45 = tpu.matmul %44, %0, %cst_36 {dimension_numbers = #tpu.dot_dimension_numbers<[1], [0], [0], [1], [0, 0, 1, 1], [], []>} : vector<16x64xbf16>, vector<64x256xbf16>, vector<16x256xf32> -> vector<16x256xf32>
    %c3_37 = arith.constant 3 : index
    %c0_38 = arith.constant 0 : index
    %46 = vector.load %arg5[%c3_37, %c0_38] : memref<4x256xf32, #tpu.memory_space<vmem>>, vector<1x256xf32>
    %47 = vector.broadcast %46 : vector<1x256xf32> to vector<16x256xf32>
    %48 = arith.mulf %45, %47 : vector<16x256xf32>
    %49 = vector.extract_strided_slice %48 {offsets = [0, 0], sizes = [16, 128], strides = [1, 1]} : vector<16x256xf32> to vector<16x128xf32>
    %c0_39 = arith.constant 0 : index
    %c3_40 = arith.constant 3 : index
    %c0_41 = arith.constant 0 : index
    %50 = vector.load %arg7[%c0_39, %c3_40, %c0_41] : memref<16x12x128xf32, #tpu.memory_space<vmem>>, vector<16x1x128xf32>
    %51 = vector.shape_cast %50 : vector<16x1x128xf32> to vector<16x128xf32>
    %52 = vector.shape_cast %49 : vector<16x128xf32> to vector<16x1x128xf32>
    tpu.vector_store %arg7[%c0_39, %c3_40, %c0_41], %52 {strides = array<i32>} : memref<16x12x128xf32, #tpu.memory_space<vmem>>, vector<16x1x128xf32>,
    %53 = vector.extract_strided_slice %48 {offsets = [0, 128], sizes = [16, 128], strides = [1, 1]} : vector<16x256xf32> to vector<16x128xf32>
    %c0_42 = arith.constant 0 : index
    %c3_43 = arith.constant 3 : index
    %c0_44 = arith.constant 0 : index
    %54 = vector.load %arg8[%c0_42, %c3_43, %c0_44] : memref<16x12x128xf32, #tpu.memory_space<vmem>>, vector<16x1x128xf32>
    %55 = vector.shape_cast %54 : vector<16x1x128xf32> to vector<16x128xf32>
    %56 = vector.shape_cast %53 : vector<16x128xf32> to vector<16x1x128xf32>
    tpu.vector_store %arg8[%c0_42, %c3_43, %c0_44], %56 {strides = array<i32>} : memref<16x12x128xf32, #tpu.memory_space<vmem>>, vector<16x1x128xf32>,
    %c0_45 = arith.constant 0 : index
    %c0_46 = arith.constant 0 : index
    %57 = vector.load %arg4[%c0_45, %c0_46] : memref<16x256xbf16, #tpu.memory_space<vmem>>, vector<16x256xbf16>
    %c0_47 = arith.constant 0 : index
    %c0_48 = arith.constant 0 : index
    %c0_49 = arith.constant 0 : index
    %58 = vector.load %arg2[%c0_47, %c0_48, %c0_49] : memref<8x16x16xbf16, #tpu.memory_space<vmem>>, vector<1x16x16xbf16>
    %59 = vector.shape_cast %58 : vector<1x16x16xbf16> to vector<16x16xbf16>
    %cst_50 = arith.constant dense<0.000000e+00> : vector<16x256xf32>
    %60 = tpu.matmul %59, %57, %cst_50 {dimension_numbers = #tpu.dot_dimension_numbers<[1], [0], [0], [1], [0, 0, 1, 1], [], []>} : vector<16x16xbf16>, vector<16x256xbf16>, vector<16x256xf32> -> vector<16x256xf32>
    %c0_51 = arith.constant 0 : index
    %c0_52 = arith.constant 0 : index
    %61 = vector.load %arg6[%c0_51, %c0_52] : memref<8x256xf32, #tpu.memory_space<vmem>>, vector<1x256xf32>
    %62 = vector.broadcast %61 : vector<1x256xf32> to vector<16x256xf32>
    %63 = arith.mulf %60, %62 : vector<16x256xf32>
    %64 = vector.extract_strided_slice %63 {offsets = [0, 0], sizes = [16, 128], strides = [1, 1]} : vector<16x256xf32> to vector<16x128xf32>
    %c0_53 = arith.constant 0 : index
    %c4 = arith.constant 4 : index
    %c0_54 = arith.constant 0 : index
    %65 = vector.load %arg7[%c0_53, %c4, %c0_54] : memref<16x12x128xf32, #tpu.memory_space<vmem>>, vector<16x1x128xf32>
    %66 = vector.shape_cast %65 : vector<16x1x128xf32> to vector<16x128xf32>
    %67 = vector.shape_cast %64 : vector<16x128xf32> to vector<16x1x128xf32>
    tpu.vector_store %arg7[%c0_53, %c4, %c0_54], %67 {strides = array<i32>} : memref<16x12x128xf32, #tpu.memory_space<vmem>>, vector<16x1x128xf32>,
    %68 = vector.extract_strided_slice %63 {offsets = [0, 128], sizes = [16, 128], strides = [1, 1]} : vector<16x256xf32> to vector<16x128xf32>
    %c0_55 = arith.constant 0 : index
    %c4_56 = arith.constant 4 : index
    %c0_57 = arith.constant 0 : index
    %69 = vector.load %arg8[%c0_55, %c4_56, %c0_57] : memref<16x12x128xf32, #tpu.memory_space<vmem>>, vector<16x1x128xf32>
    %70 = vector.shape_cast %69 : vector<16x1x128xf32> to vector<16x128xf32>
    %71 = vector.shape_cast %68 : vector<16x128xf32> to vector<16x1x128xf32>
    tpu.vector_store %arg8[%c0_55, %c4_56, %c0_57], %71 {strides = array<i32>} : memref<16x12x128xf32, #tpu.memory_space<vmem>>, vector<16x1x128xf32>,
    %c1_58 = arith.constant 1 : index
    %c0_59 = arith.constant 0 : index
    %c0_60 = arith.constant 0 : index
    %72 = vector.load %arg2[%c1_58, %c0_59, %c0_60] : memref<8x16x16xbf16, #tpu.memory_space<vmem>>, vector<1x16x16xbf16>
    %73 = vector.shape_cast %72 : vector<1x16x16xbf16> to vector<16x16xbf16>
    %cst_61 = arith.constant dense<0.000000e+00> : vector<16x256xf32>
    %74 = tpu.matmul %73, %57, %cst_61 {dimension_numbers = #tpu.dot_dimension_numbers<[1], [0], [0], [1], [0, 0, 1, 1], [], []>} : vector<16x16xbf16>, vector<16x256xbf16>, vector<16x256xf32> -> vector<16x256xf32>
    %c1_62 = arith.constant 1 : index
    %c0_63 = arith.constant 0 : index
    %75 = vector.load %arg6[%c1_62, %c0_63] : memref<8x256xf32, #tpu.memory_space<vmem>>, vector<1x256xf32>
    %76 = vector.broadcast %75 : vector<1x256xf32> to vector<16x256xf32>
    %77 = arith.mulf %74, %76 : vector<16x256xf32>
    %78 = vector.extract_strided_slice %77 {offsets = [0, 0], sizes = [16, 128], strides = [1, 1]} : vector<16x256xf32> to vector<16x128xf32>
    %c0_64 = arith.constant 0 : index
    %c5 = arith.constant 5 : index
    %c0_65 = arith.constant 0 : index
    %79 = vector.load %arg7[%c0_64, %c5, %c0_65] : memref<16x12x128xf32, #tpu.memory_space<vmem>>, vector<16x1x128xf32>
    %80 = vector.shape_cast %79 : vector<16x1x128xf32> to vector<16x128xf32>
    %81 = vector.shape_cast %78 : vector<16x128xf32> to vector<16x1x128xf32>
    tpu.vector_store %arg7[%c0_64, %c5, %c0_65], %81 {strides = array<i32>} : memref<16x12x128xf32, #tpu.memory_space<vmem>>, vector<16x1x128xf32>,
    %82 = vector.extract_strided_slice %77 {offsets = [0, 128], sizes = [16, 128], strides = [1, 1]} : vector<16x256xf32> to vector<16x128xf32>
    %c0_66 = arith.constant 0 : index
    %c5_67 = arith.constant 5 : index
    %c0_68 = arith.constant 0 : index
    %83 = vector.load %arg8[%c0_66, %c5_67, %c0_68] : memref<16x12x128xf32, #tpu.memory_space<vmem>>, vector<16x1x128xf32>
    %84 = vector.shape_cast %83 : vector<16x1x128xf32> to vector<16x128xf32>
    %85 = vector.shape_cast %82 : vector<16x128xf32> to vector<16x1x128xf32>
    tpu.vector_store %arg8[%c0_66, %c5_67, %c0_68], %85 {strides = array<i32>} : memref<16x12x128xf32, #tpu.memory_space<vmem>>, vector<16x1x128xf32>,
    %c2_69 = arith.constant 2 : index
    %c0_70 = arith.constant 0 : index
    %c0_71 = arith.constant 0 : index
    %86 = vector.load %arg2[%c2_69, %c0_70, %c0_71] : memref<8x16x16xbf16, #tpu.memory_space<vmem>>, vector<1x16x16xbf16>
    %87 = vector.shape_cast %86 : vector<1x16x16xbf16> to vector<16x16xbf16>
    %cst_72 = arith.constant dense<0.000000e+00> : vector<16x256xf32>
    %88 = tpu.matmul %87, %57, %cst_72 {dimension_numbers = #tpu.dot_dimension_numbers<[1], [0], [0], [1], [0, 0, 1, 1], [], []>} : vector<16x16xbf16>, vector<16x256xbf16>, vector<16x256xf32> -> vector<16x256xf32>
    %c2_73 = arith.constant 2 : index
    %c0_74 = arith.constant 0 : index
    %89 = vector.load %arg6[%c2_73, %c0_74] : memref<8x256xf32, #tpu.memory_space<vmem>>, vector<1x256xf32>
    %90 = vector.broadcast %89 : vector<1x256xf32> to vector<16x256xf32>
    %91 = arith.mulf %88, %90 : vector<16x256xf32>
    %92 = vector.extract_strided_slice %91 {offsets = [0, 0], sizes = [16, 128], strides = [1, 1]} : vector<16x256xf32> to vector<16x128xf32>
    %c0_75 = arith.constant 0 : index
    %c6 = arith.constant 6 : index
    %c0_76 = arith.constant 0 : index
    %93 = vector.load %arg7[%c0_75, %c6, %c0_76] : memref<16x12x128xf32, #tpu.memory_space<vmem>>, vector<16x1x128xf32>
    %94 = vector.shape_cast %93 : vector<16x1x128xf32> to vector<16x128xf32>
    %95 = vector.shape_cast %92 : vector<16x128xf32> to vector<16x1x128xf32>
    tpu.vector_store %arg7[%c0_75, %c6, %c0_76], %95 {strides = array<i32>} : memref<16x12x128xf32, #tpu.memory_space<vmem>>, vector<16x1x128xf32>,
    %96 = vector.extract_strided_slice %91 {offsets = [0, 128], sizes = [16, 128], strides = [1, 1]} : vector<16x256xf32> to vector<16x128xf32>
    %c0_77 = arith.constant 0 : index
    %c6_78 = arith.constant 6 : index
    %c0_79 = arith.constant 0 : index
    %97 = vector.load %arg8[%c0_77, %c6_78, %c0_79] : memref<16x12x128xf32, #tpu.memory_space<vmem>>, vector<16x1x128xf32>
    %98 = vector.shape_cast %97 : vector<16x1x128xf32> to vector<16x128xf32>
    %99 = vector.shape_cast %96 : vector<16x128xf32> to vector<16x1x128xf32>
    tpu.vector_store %arg8[%c0_77, %c6_78, %c0_79], %99 {strides = array<i32>} : memref<16x12x128xf32, #tpu.memory_space<vmem>>, vector<16x1x128xf32>,
    %c3_80 = arith.constant 3 : index
    %c0_81 = arith.constant 0 : index
    %c0_82 = arith.constant 0 : index
    %100 = vector.load %arg2[%c3_80, %c0_81, %c0_82] : memref<8x16x16xbf16, #tpu.memory_space<vmem>>, vector<1x16x16xbf16>
    %101 = vector.shape_cast %100 : vector<1x16x16xbf16> to vector<16x16xbf16>
    %cst_83 = arith.constant dense<0.000000e+00> : vector<16x256xf32>
    %102 = tpu.matmul %101, %57, %cst_83 {dimension_numbers = #tpu.dot_dimension_numbers<[1], [0], [0], [1], [0, 0, 1, 1], [], []>} : vector<16x16xbf16>, vector<16x256xbf16>, vector<16x256xf32> -> vector<16x256xf32>
    %c3_84 = arith.constant 3 : index
    %c0_85 = arith.constant 0 : index
    %103 = vector.load %arg6[%c3_84, %c0_85] : memref<8x256xf32, #tpu.memory_space<vmem>>, vector<1x256xf32>
    %104 = vector.broadcast %103 : vector<1x256xf32> to vector<16x256xf32>
    %105 = arith.mulf %102, %104 : vector<16x256xf32>
    %106 = vector.extract_strided_slice %105 {offsets = [0, 0], sizes = [16, 128], strides = [1, 1]} : vector<16x256xf32> to vector<16x128xf32>
    %c0_86 = arith.constant 0 : index
    %c7 = arith.constant 7 : index
    %c0_87 = arith.constant 0 : index
    %107 = vector.load %arg7[%c0_86, %c7, %c0_87] : memref<16x12x128xf32, #tpu.memory_space<vmem>>, vector<16x1x128xf32>
    %108 = vector.shape_cast %107 : vector<16x1x128xf32> to vector<16x128xf32>
    %109 = vector.shape_cast %106 : vector<16x128xf32> to vector<16x1x128xf32>
    tpu.vector_store %arg7[%c0_86, %c7, %c0_87], %109 {strides = array<i32>} : memref<16x12x128xf32, #tpu.memory_space<vmem>>, vector<16x1x128xf32>,
    %110 = vector.extract_strided_slice %105 {offsets = [0, 128], sizes = [16, 128], strides = [1, 1]} : vector<16x256xf32> to vector<16x128xf32>
    %c0_88 = arith.constant 0 : index
    %c7_89 = arith.constant 7 : index
    %c0_90 = arith.constant 0 : index
    %111 = vector.load %arg8[%c0_88, %c7_89, %c0_90] : memref<16x12x128xf32, #tpu.memory_space<vmem>>, vector<16x1x128xf32>
    %112 = vector.shape_cast %111 : vector<16x1x128xf32> to vector<16x128xf32>
    %113 = vector.shape_cast %110 : vector<16x128xf32> to vector<16x1x128xf32>
    tpu.vector_store %arg8[%c0_88, %c7_89, %c0_90], %113 {strides = array<i32>} : memref<16x12x128xf32, #tpu.memory_space<vmem>>, vector<16x1x128xf32>,
    %c4_91 = arith.constant 4 : index
    %c0_92 = arith.constant 0 : index
    %c0_93 = arith.constant 0 : index
    %114 = vector.load %arg2[%c4_91, %c0_92, %c0_93] : memref<8x16x16xbf16, #tpu.memory_space<vmem>>, vector<1x16x16xbf16>
    %115 = vector.shape_cast %114 : vector<1x16x16xbf16> to vector<16x16xbf16>
    %cst_94 = arith.constant dense<0.000000e+00> : vector<16x256xf32>
    %116 = tpu.matmul %115, %57, %cst_94 {dimension_numbers = #tpu.dot_dimension_numbers<[1], [0], [0], [1], [0, 0, 1, 1], [], []>} : vector<16x16xbf16>, vector<16x256xbf16>, vector<16x256xf32> -> vector<16x256xf32>
    %c4_95 = arith.constant 4 : index
    %c0_96 = arith.constant 0 : index
    %117 = vector.load %arg6[%c4_95, %c0_96] : memref<8x256xf32, #tpu.memory_space<vmem>>, vector<1x256xf32>
    %118 = vector.broadcast %117 : vector<1x256xf32> to vector<16x256xf32>
    %119 = arith.mulf %116, %118 : vector<16x256xf32>
    %120 = vector.extract_strided_slice %119 {offsets = [0, 0], sizes = [16, 128], strides = [1, 1]} : vector<16x256xf32> to vector<16x128xf32>
    %c0_97 = arith.constant 0 : index
    %c8 = arith.constant 8 : index
    %c0_98 = arith.constant 0 : index
    %121 = vector.load %arg7[%c0_97, %c8, %c0_98] : memref<16x12x128xf32, #tpu.memory_space<vmem>>, vector<16x1x128xf32>
    %122 = vector.shape_cast %121 : vector<16x1x128xf32> to vector<16x128xf32>
    %123 = vector.shape_cast %120 : vector<16x128xf32> to vector<16x1x128xf32>
    tpu.vector_store %arg7[%c0_97, %c8, %c0_98], %123 {strides = array<i32>} : memref<16x12x128xf32, #tpu.memory_space<vmem>>, vector<16x1x128xf32>,
    %124 = vector.extract_strided_slice %119 {offsets = [0, 128], sizes = [16, 128], strides = [1, 1]} : vector<16x256xf32> to vector<16x128xf32>
    %c0_99 = arith.constant 0 : index
    %c8_100 = arith.constant 8 : index
    %c0_101 = arith.constant 0 : index
    %125 = vector.load %arg8[%c0_99, %c8_100, %c0_101] : memref<16x12x128xf32, #tpu.memory_space<vmem>>, vector<16x1x128xf32>
    %126 = vector.shape_cast %125 : vector<16x1x128xf32> to vector<16x128xf32>
    %127 = vector.shape_cast %124 : vector<16x128xf32> to vector<16x1x128xf32>
    tpu.vector_store %arg8[%c0_99, %c8_100, %c0_101], %127 {strides = array<i32>} : memref<16x12x128xf32, #tpu.memory_space<vmem>>, vector<16x1x128xf32>,
    %c5_102 = arith.constant 5 : index
    %c0_103 = arith.constant 0 : index
    %c0_104 = arith.constant 0 : index
    %128 = vector.load %arg2[%c5_102, %c0_103, %c0_104] : memref<8x16x16xbf16, #tpu.memory_space<vmem>>, vector<1x16x16xbf16>
    %129 = vector.shape_cast %128 : vector<1x16x16xbf16> to vector<16x16xbf16>
    %cst_105 = arith.constant dense<0.000000e+00> : vector<16x256xf32>
    %130 = tpu.matmul %129, %57, %cst_105 {dimension_numbers = #tpu.dot_dimension_numbers<[1], [0], [0], [1], [0, 0, 1, 1], [], []>} : vector<16x16xbf16>, vector<16x256xbf16>, vector<16x256xf32> -> vector<16x256xf32>
    %c5_106 = arith.constant 5 : index
    %c0_107 = arith.constant 0 : index
    %131 = vector.load %arg6[%c5_106, %c0_107] : memref<8x256xf32, #tpu.memory_space<vmem>>, vector<1x256xf32>
    %132 = vector.broadcast %131 : vector<1x256xf32> to vector<16x256xf32>
    %133 = arith.mulf %130, %132 : vector<16x256xf32>
    %134 = vector.extract_strided_slice %133 {offsets = [0, 0], sizes = [16, 128], strides = [1, 1]} : vector<16x256xf32> to vector<16x128xf32>
    %c0_108 = arith.constant 0 : index
    %c9 = arith.constant 9 : index
    %c0_109 = arith.constant 0 : index
    %135 = vector.load %arg7[%c0_108, %c9, %c0_109] : memref<16x12x128xf32, #tpu.memory_space<vmem>>, vector<16x1x128xf32>
    %136 = vector.shape_cast %135 : vector<16x1x128xf32> to vector<16x128xf32>
    %137 = vector.shape_cast %134 : vector<16x128xf32> to vector<16x1x128xf32>
    tpu.vector_store %arg7[%c0_108, %c9, %c0_109], %137 {strides = array<i32>} : memref<16x12x128xf32, #tpu.memory_space<vmem>>, vector<16x1x128xf32>,
    %138 = vector.extract_strided_slice %133 {offsets = [0, 128], sizes = [16, 128], strides = [1, 1]} : vector<16x256xf32> to vector<16x128xf32>
    %c0_110 = arith.constant 0 : index
    %c9_111 = arith.constant 9 : index
    %c0_112 = arith.constant 0 : index
    %139 = vector.load %arg8[%c0_110, %c9_111, %c0_112] : memref<16x12x128xf32, #tpu.memory_space<vmem>>, vector<16x1x128xf32>
    %140 = vector.shape_cast %139 : vector<16x1x128xf32> to vector<16x128xf32>
    %141 = vector.shape_cast %138 : vector<16x128xf32> to vector<16x1x128xf32>
    tpu.vector_store %arg8[%c0_110, %c9_111, %c0_112], %141 {strides = array<i32>} : memref<16x12x128xf32, #tpu.memory_space<vmem>>, vector<16x1x128xf32>,
    %c6_113 = arith.constant 6 : index
    %c0_114 = arith.constant 0 : index
    %c0_115 = arith.constant 0 : index
    %142 = vector.load %arg2[%c6_113, %c0_114, %c0_115] : memref<8x16x16xbf16, #tpu.memory_space<vmem>>, vector<1x16x16xbf16>
    %143 = vector.shape_cast %142 : vector<1x16x16xbf16> to vector<16x16xbf16>
    %cst_116 = arith.constant dense<0.000000e+00> : vector<16x256xf32>
    %144 = tpu.matmul %143, %57, %cst_116 {dimension_numbers = #tpu.dot_dimension_numbers<[1], [0], [0], [1], [0, 0, 1, 1], [], []>} : vector<16x16xbf16>, vector<16x256xbf16>, vector<16x256xf32> -> vector<16x256xf32>
    %c6_117 = arith.constant 6 : index
    %c0_118 = arith.constant 0 : index
    %145 = vector.load %arg6[%c6_117, %c0_118] : memref<8x256xf32, #tpu.memory_space<vmem>>, vector<1x256xf32>
    %146 = vector.broadcast %145 : vector<1x256xf32> to vector<16x256xf32>
    %147 = arith.mulf %144, %146 : vector<16x256xf32>
    %148 = vector.extract_strided_slice %147 {offsets = [0, 0], sizes = [16, 128], strides = [1, 1]} : vector<16x256xf32> to vector<16x128xf32>
    %c0_119 = arith.constant 0 : index
    %c10 = arith.constant 10 : index
    %c0_120 = arith.constant 0 : index
    %149 = vector.load %arg7[%c0_119, %c10, %c0_120] : memref<16x12x128xf32, #tpu.memory_space<vmem>>, vector<16x1x128xf32>
    %150 = vector.shape_cast %149 : vector<16x1x128xf32> to vector<16x128xf32>
    %151 = vector.shape_cast %148 : vector<16x128xf32> to vector<16x1x128xf32>
    tpu.vector_store %arg7[%c0_119, %c10, %c0_120], %151 {strides = array<i32>} : memref<16x12x128xf32, #tpu.memory_space<vmem>>, vector<16x1x128xf32>,
    %152 = vector.extract_strided_slice %147 {offsets = [0, 128], sizes = [16, 128], strides = [1, 1]} : vector<16x256xf32> to vector<16x128xf32>
    %c0_121 = arith.constant 0 : index
    %c10_122 = arith.constant 10 : index
    %c0_123 = arith.constant 0 : index
    %153 = vector.load %arg8[%c0_121, %c10_122, %c0_123] : memref<16x12x128xf32, #tpu.memory_space<vmem>>, vector<16x1x128xf32>
    %154 = vector.shape_cast %153 : vector<16x1x128xf32> to vector<16x128xf32>
    %155 = vector.shape_cast %152 : vector<16x128xf32> to vector<16x1x128xf32>
    tpu.vector_store %arg8[%c0_121, %c10_122, %c0_123], %155 {strides = array<i32>} : memref<16x12x128xf32, #tpu.memory_space<vmem>>, vector<16x1x128xf32>,
    %c7_124 = arith.constant 7 : index
    %c0_125 = arith.constant 0 : index
    %c0_126 = arith.constant 0 : index
    %156 = vector.load %arg2[%c7_124, %c0_125, %c0_126] : memref<8x16x16xbf16, #tpu.memory_space<vmem>>, vector<1x16x16xbf16>
    %157 = vector.shape_cast %156 : vector<1x16x16xbf16> to vector<16x16xbf16>
    %cst_127 = arith.constant dense<0.000000e+00> : vector<16x256xf32>
    %158 = tpu.matmul %157, %57, %cst_127 {dimension_numbers = #tpu.dot_dimension_numbers<[1], [0], [0], [1], [0, 0, 1, 1], [], []>} : vector<16x16xbf16>, vector<16x256xbf16>, vector<16x256xf32> -> vector<16x256xf32>
    %c7_128 = arith.constant 7 : index
    %c0_129 = arith.constant 0 : index
    %159 = vector.load %arg6[%c7_128, %c0_129] : memref<8x256xf32, #tpu.memory_space<vmem>>, vector<1x256xf32>
    %160 = vector.broadcast %159 : vector<1x256xf32> to vector<16x256xf32>
    %161 = arith.mulf %158, %160 : vector<16x256xf32>
    %162 = vector.extract_strided_slice %161 {offsets = [0, 0], sizes = [16, 128], strides = [1, 1]} : vector<16x256xf32> to vector<16x128xf32>
    %c0_130 = arith.constant 0 : index
    %c11 = arith.constant 11 : index
    %c0_131 = arith.constant 0 : index
    %163 = vector.load %arg7[%c0_130, %c11, %c0_131] : memref<16x12x128xf32, #tpu.memory_space<vmem>>, vector<16x1x128xf32>
    %164 = vector.shape_cast %163 : vector<16x1x128xf32> to vector<16x128xf32>
    %165 = vector.shape_cast %162 : vector<16x128xf32> to vector<16x1x128xf32>
    tpu.vector_store %arg7[%c0_130, %c11, %c0_131], %165 {strides = array<i32>} : memref<16x12x128xf32, #tpu.memory_space<vmem>>, vector<16x1x128xf32>,
    %166 = vector.extract_strided_slice %161 {offsets = [0, 128], sizes = [16, 128], strides = [1, 1]} : vector<16x256xf32> to vector<16x128xf32>
    %c0_132 = arith.constant 0 : index
    %c11_133 = arith.constant 11 : index
    %c0_134 = arith.constant 0 : index
    %167 = vector.load %arg8[%c0_132, %c11_133, %c0_134] : memref<16x12x128xf32, #tpu.memory_space<vmem>>, vector<16x1x128xf32>
    %168 = vector.shape_cast %167 : vector<16x1x128xf32> to vector<16x128xf32>
    %169 = vector.shape_cast %166 : vector<16x128xf32> to vector<16x1x128xf32>
    tpu.vector_store %arg8[%c0_132, %c11_133, %c0_134], %169 {strides = array<i32>} : memref<16x12x128xf32, #tpu.memory_space<vmem>>, vector<16x1x128xf32>,
    return
  }
  func.func @transform_0(%arg0: i32) -> (i32, i32, i32) {
    %c0_i32 = arith.constant 0 : i32
    %c0_i32_0 = arith.constant 0 : i32
    %c0_i32_1 = arith.constant 0 : i32
    return %c0_i32, %arg0, %c0_i32_0 : i32, i32, i32
  }
  func.func @transform_1(%arg0: i32) -> (i32, i32, i32) {
    %c0_i32 = arith.constant 0 : i32
    %c0_i32_0 = arith.constant 0 : i32
    %c0_i32_1 = arith.constant 0 : i32
    return %c0_i32, %arg0, %c0_i32_0 : i32, i32, i32
  }
  func.func @transform_2(%arg0: i32) -> (i32, i32) {
    %c0_i32 = arith.constant 0 : i32
    %c0_i32_0 = arith.constant 0 : i32
    %c0_i32_1 = arith.constant 0 : i32
    return %c0_i32, %c0_i32_0 : i32, i32
  }
  func.func @transform_3(%arg0: i32) -> (i32, i32) {
    %c0_i32 = arith.constant 0 : i32
    %c0_i32_0 = arith.constant 0 : i32
    %c0_i32_1 = arith.constant 0 : i32
    return %c0_i32, %c0_i32_0 : i32, i32
  }
  func.func @transform_4(%arg0: i32) -> (i32, i32) {
    %c0_i32 = arith.constant 0 : i32
    %c0_i32_0 = arith.constant 0 : i32
    %c0_i32_1 = arith.constant 0 : i32
    return %c0_i32, %c0_i32_0 : i32, i32
  }
  func.func @transform_5(%arg0: i32) -> (i32, i32) {
    %c0_i32 = arith.constant 0 : i32
    %c0_i32_0 = arith.constant 0 : i32
    %c0_i32_1 = arith.constant 0 : i32
    return %c0_i32, %c0_i32_0 : i32, i32
  }
  func.func @transform_6(%arg0: i32) -> (i32, i32, i32) {
    %c0_i32 = arith.constant 0 : i32
    %c0_i32_0 = arith.constant 0 : i32
    %c0_i32_1 = arith.constant 0 : i32
    return %arg0, %c0_i32, %c0_i32_0 : i32, i32, i32
  }
  func.func @transform_7(%arg0: i32) -> (i32, i32, i32) {
    %c0_i32 = arith.constant 0 : i32
    %c0_i32_0 = arith.constant 0 : i32
    %c0_i32_1 = arith.constant 0 : i32
    return %arg0, %c0_i32, %c0_i32_0 : i32, i32, i32
  }
}

</mosaic_0001>

<bundles_post_ra>
// kernel: _lambda_.1
= control target key start
LH: loop header
LB: loop body
LE: loop exit
PB: predicated region body
PF: predicated region fallthrough
CT: control target
= control target key end

     0   :  { %s2654_s24 = smov 0   ;;  %s2656_s25 = smov 0   ;;  %s3384_s0 = inlined_call_operand.vmem [shape: bf16[4,32,64], index: 0, kind: input, shape index: {}]   ;;  %s3385_s1 = inlined_call_operand.vmem [shape: bf16[8,32,16], index: 1, kind: input, shape index: {}]   ;;  %s3386_s2 = inlined_call_operand.vmem [shape: bf16[64,256], index: 2, kind: input, shape index: {}]   ;;  %s3387_s3 = inlined_call_operand.vmem [shape: bf16[16,256], index: 3, kind: input, shape index: {}]   ;;  %s3388_s4 = inlined_call_operand.vmem [shape: f32[4,256], index: 4, kind: input, shape index: {}]   ;;  %s3389_s5 = inlined_call_operand.vmem [shape: f32[8,256], index: 5, kind: input, shape index: {}]   ;;  %s3390_s6 = inlined_call_operand.vmem [shape: f32[32,12,128], index: 6, kind: output, shape index: {0}]   ;;  %s3391_s7 = inlined_call_operand.vmem [shape: f32[32,12,128], index: 7, kind: output, shape index: {1}]  }
   0x1   :  { %s2658_s26 = smov 0  }
   0x2 LB: > { %s2377_s27 = sadd.s32 4294967295, %s2612_s26   ;;  %s2671_s28 = sadd.s32 1, %s2612_s26   ;;  %s2612_s26 = sphi %s2658_s26, %s3395_s26   ;;  %s2608_s25 = sphi %s2656_s25, %s3394_s25   ;;  %s2604_s24 = sphi %s2654_s24, %s3393_s24  }
   0x3   : > { %s22_s29 = ssub.s32 %s2612_s26, %s2671_s28  ;;  %s25_s30 = sadd.s32 1, %s2608_s25 }
   0x4   : > { %p23_p0 = scmp.eq.s32.totalorder %s22_s29, 0  ;;  %p32_p1 = scmp.ne.s32.totalorder %s2608_s25, %s2604_s24 }
   0x5   : > { %p33_p2 = scmp.eq.s32.totalorder %s2612_s26, 0  ;;  %p2380_p4 = scmp.ge.s32.totalorder %s2612_s26, 2 }
   0x6   : > { %s2680_s8 = scalar_select %p23_p0, %s2608_s25, %s25_s30  }
   0x7   : > { %p2682_p3 = por %p33_p2, %p32_p1  ;;  %232 = sbr.rel (%p2380_p4) target bundleno = 32 (0x20), region = 32 }
   0xc   : > { %235 = sbr.rel (!%p2682_p3) target bundleno = 20 (0x14), region = 36  ;;  %s237_s10 = sand.u32 (%p2682_p3), 1, %s2608_s25  }
   0xd   : > { %s2540_s11 = sshll.u32 (%p2682_p3), %s2612_s26, 3  ;;  %s2381_s12 = sshll.u32 (%p2682_p3), %s237_s10, 5 }
   0xe   : > { %s242_s15 = scalar_lea.vmem (%p2682_p3), %s3384_s0, %s2540_s11  ;;  %s239_s16 = scalar_lea.vmem (%p2682_p3), [#allocation2], %s2381_s12 }
   0xf   : > { %v259_v0 = vld [vmem:[%s242_s15] sm:$0xff] (%p2682_p3)   ;;  %v263_v1 = vld [vmem:[%s242_s15 + $0x10] sm:$0xff] (%p2682_p3)  }
  0x10   : > { %v267_v2 = vld [vmem:[%s242_s15 + $0x20] sm:$0xff] (%p2682_p3)   ;;  %260 = vst [vmem:[%s239_s16] sm:$0xff] (%p2682_p3), %v259_v0   ;;  %v271_v3 = vld [vmem:[%s242_s15 + $0x30] sm:$0xff] (%p2682_p3)  }
  0x11   : > { %264 = vst [vmem:[%s239_s16 + $0x8] sm:$0xff] %v263_v1  }
  0x12   : > { %268 = vst [vmem:[%s239_s16 + $0x10] sm:$0xff] %v267_v2  }
  0x13   : > { %272 = vst [vmem:[%s239_s16 + $0x18] sm:$0xff] %v271_v3  }
  0x14 PF: > { %314 = sbr.rel (!%p2682_p3) target bundleno = 32 (0x20), region = 77  ;;  %s316_s17 = sand.u32 (%p2682_p3), 1, %s2608_s25  }
  0x15   : > { %s2541_s18 = sshll.u32 (%p2682_p3), %s2612_s26, 3  ;;  %s2384_s19 = sshll.u32 (%p2682_p3), %s316_s17, 6 }
  0x16   : > { %s321_s22 = scalar_lea.vmem (%p2682_p3), %s3385_s1, %s2541_s18  ;;  %s318_s23 = scalar_lea.vmem (%p2682_p3), [#allocation3], %s2384_s19 }
  0x17   : > { %v338_v4 = vld [vmem:[%s321_s22] sm:$0xff] (%p2682_p3)   ;;  %v342_v5 = vld [vmem:[%s321_s22 + $0x10] sm:$0xff] (%p2682_p3)  }
  0x18   : > { %v346_v6 = vld [vmem:[%s321_s22 + $0x20] sm:$0xff] (%p2682_p3)   ;;  %339 = vst [vmem:[%s318_s23] sm:$0xff] (%p2682_p3), %v338_v4   ;;  %v350_v7 = vld [vmem:[%s321_s22 + $0x30] sm:$0xff] (%p2682_p3)  }
  0x19   : > { %343 = vst [vmem:[%s318_s23 + $0x8] sm:$0xff] %v342_v5   ;;  %v354_v8 = vld [vmem:[%s321_s22 + $0x40] sm:$0xff]   ;;  %v358_v9 = vld [vmem:[%s321_s22 + $0x50] sm:$0xff]  }
  0x1a   : > { %347 = vst [vmem:[%s318_s23 + $0x10] sm:$0xff] %v346_v6   ;;  %v362_v10 = vld [vmem:[%s321_s22 + $0x60] sm:$0xff]   ;;  %v366_v11 = vld [vmem:[%s321_s22 + $0x70] sm:$0xff]  }
  0x1b   : > { %351 = vst [vmem:[%s318_s23 + $0x18] sm:$0xff] %v350_v7  }
  0x1c   : > { %355 = vst [vmem:[%s318_s23 + $0x20] sm:$0xff] %v354_v8  }
  0x1d   : > { %359 = vst [vmem:[%s318_s23 + $0x28] sm:$0xff] %v358_v9  }
  0x1e   : > { %363 = vst [vmem:[%s318_s23 + $0x30] sm:$0xff] %v362_v10  }
  0x1f   : > { %367 = vst [vmem:[%s318_s23 + $0x38] sm:$0xff] %v366_v11  }
  0x20 PF: > { %p2387_p5 = scmp.ge.s32.totalorder %s2612_s26, 1  ;;  %p424_p6 = scmp.lt.s32.totalorder %s2612_s26, 3 }
  0x22   : > { %p425_p7 = pnand %p2387_p5, %p424_p6 }
  0x23   : > { %s431_s14 = sand.u32 (!%p425_p7), 1, %s2604_s24   ;;  %s2390_s24 = sshll.u32 (!%p425_p7), %s2377_s27, 4 }
  0x24   : > { %428 = sbr.rel (%p425_p7) target bundleno = 571 (0x23b), region = 118  ;;  %s2388_s19 = sshll.u32 (!%p425_p7), %s431_s14, 5 }
  0x25   : > { %s2754_s29 = scalar_lea.vmem (!%p425_p7), [#allocation2], %s2388_s19  ;;  %s2389_s17 = sshll.u32 (!%p425_p7), %s431_s14, 6 }
  0x26   : > { %s440_s18 = scalar_lea.vmem (!%p425_p7), [#allocation3], %s2389_s17  ;;  %p483_p8 = scmp.lt.s32.totalorder (!%p425_p7), %s2390_s24, 31 }
  0x29   : > { %v2426_v12 = vld [vmem:[%s3386_s2 + $0x30] sm:$0xf]  ;;  %v2551_v13 = vld [vmem:[%s3386_s2 + $0x34] sm:$0xf0]  ;;  %v2550_v14 = vld [vmem:[%s3386_s2 + $0x34] sm:$0xf] }
  0x2a   : > { %v2427_v15 = vor.u32 %v2551_v13, %v2426_v12  ;;  %v2428_v16 = vld [vmem:[%s3386_s2 + $0x38] sm:$0xf0]  ;;  %v2418_v17 = vld [vmem:[%s3386_s2 + $0x20] sm:$0xf]  ;;  %v2549_v18 = vld [vmem:[%s3386_s2 + $0x24] sm:$0xf0] }
  0x2b   : > { %v2431_v19 = vor.u32 %v2550_v14, %v2428_v16  ;;  %v2548_v20 = vld [vmem:[%s3386_s2 + $0x24] sm:$0xf]  ;;  %v2420_v21 = vld [vmem:[%s3386_s2 + $0x28] sm:$0xf0]  ;;  %v2419_v22 = vor.u32 %v2549_v18, %v2418_v17  ;;  %v2410_v24 = vld [vmem:[%s3386_s2 + $0x10] sm:$0xf] }
  0x2c   : > { %560 = vmatpush.bf16.msra.mxu0 %v2427_v15  ;;  %701 = vmatpush.bf16.msra.mxu2 %v2427_v15  ;;  %v2423_v23 = vor.u32 %v2548_v20, %v2420_v21  ;;  %v2547_v25 = vld [vmem:[%s3386_s2 + $0x14] sm:$0xf0]  ;;  %v2546_v26 = vld [vmem:[%s3386_s2 + $0x14] sm:$0xf]  ;;  %v2412_v27 = vld [vmem:[%s3386_s2 + $0x18] sm:$0xf0] }
  0x2d   : > { %574 = vmatpush.bf16.msra.mxu1 %v2431_v19  ;;  %715 = vmatpush.bf16.msra.mxu3 %v2431_v19  ;;  %v2411_v28 = vor.u32 %v2547_v25, %v2410_v24  ;;  %v2415_v29 = vor.u32 %v2546_v26, %v2412_v27  ;;  %v2402_v30 = vld [vmem:[%s3386_s2] sm:$0xf]  ;;  %v2545_v31 = vld [vmem:[%s3386_s2 + $0x4] sm:$0xf0]  ;;  %v2544_v32 = vld [vmem:[%s3386_s2 + $0x4] sm:$0xf] }
  0x2e   : > { %v2404_v33 = vld [vmem:[%s3386_s2 + $0x8] sm:$0xf0]  ;;  %v2403_v34 = vor.u32 %v2545_v31, %v2402_v30  ;;  %v2552_v36 = vld [vmem:[%s2754_s29] sm:$0xff]  ;;  %vm552_vm0 = vcmask 523264   ;;  %v2557_v39 = vld [vmem:[%s3387_s3 + $0x4] sm:$0xf0] }
  0x2f   : > { %v2407_v35 = vor.u32 %v2544_v32, %v2404_v33  ;;  %v2553_v37 = vld [vmem:[%s2754_s29 + $0x8] sm:$0xff]  ;;  %v2467_v38 = vld [vmem:[%s3387_s3] sm:$0xf]  ;;  %v2556_v40 = vld [vmem:[%s3387_s3 + $0x4] sm:$0xf]  ;;  %vm1131_vm1 = vcmask 130048  }
  0x30   : > { %561 = vmatpush.bf16.msra.mxu0 %v2419_v22  ;;  %702 = vmatpush.bf16.msra.mxu2 %v2419_v22  ;;  %v2469_v41 = vld [vmem:[%s3387_s3 + $0x8] sm:$0xf0]  ;;  %v2468_v42 = vor.u32 %v2557_v39, %v2467_v38  ;;  %v2555_v44 = vld [vmem:[%s2754_s29 + $0x18] sm:$0xff]  ;;  %v2554_v45 = vld [vmem:[%s2754_s29 + $0x10] sm:$0xff]  ;;  %s3397_s24 = smov (!%p483_p8, %s2390_s24), 31 }
  0x31   : > { %575 = vmatpush.bf16.msra.mxu1 %v2423_v23  ;;  %716 = vmatpush.bf16.msra.mxu3 %v2423_v23  ;;  %v2472_v43 = vor.u32 %v2556_v40, %v2469_v41  ;;  %v2559_v46 = vld [vmem:[%s440_s18 + $0x8] sm:$0xff]  ;;  %v2558_v47 = vld [vmem:[%s440_s18] sm:$0xff]  ;;  %v2561_v48 = vld [vmem:[%s440_s18 + $0x18] sm:$0xff]  ;;  %s2542_s20 = sshll.u32 %s3397_s24, 4 }
  0x32   : > { %v2560_v49 = vld [vmem:[%s440_s18 + $0x10] sm:$0xff]  ;;  %v2563_v50 = vld [vmem:[%s440_s18 + $0x28] sm:$0xff]  ;;  %v2562_v51 = vld [vmem:[%s440_s18 + $0x20] sm:$0xff]  ;;  %s2810_s23 = scalar_lea.vmem %s3390_s6, %s2542_s20  ;;  %s2817_s29 = scalar_lea.vmem %s3391_s7, %s2542_s20 }
  0x33   : > { %v2565_v52 = vld [vmem:[%s440_s18 + $0x38] sm:$0xff]  ;;  %v2564_v53 = vld [vmem:[%s440_s18 + $0x30] sm:$0xff]  ;;  %v2803_v54 = vld [vmem:[%s3388_s4] ss:$4 sm:$0x3] }
  0x34   : > { %562 = vmatpush.bf16.msra.mxu0 %v2411_v28  ;;  %703 = vmatpush.bf16.msra.mxu2 %v2411_v28  ;;  %v586_v55 = vperm.slane %v2803_v54, 0  ;;  %v587_v56 = vperm.slane %v2803_v54, 1  ;;  %v2827_v2 = vld [vmem:[%s3388_s4 + $0x1] ss:$4 sm:$0x3] }
  0x35   : > { %576 = vmatpush.bf16.msra.mxu1 %v2415_v29  ;;  %717 = vmatpush.bf16.msra.mxu3 %v2415_v29  ;;  %v728_v6 = vperm.slane %v2827_v2, 0  ;;  %v729_v16 = vperm.slane %v2827_v2, 1 }
  0x38   : > { %563 = vmatpush.bf16.msra.mxu0 %v2403_v34  ;;  %704 = vmatpush.bf16.msra.mxu2 %v2403_v34 }
  0x39   : > { %577 = vmatpush.bf16.msra.mxu1 %v2407_v35  ;;  %718 = vmatpush.bf16.msra.mxu3 %v2407_v35 }
  0x3b   : > { %2432 = vmatmul.msk.bf16.vlgmr.msra.gmra.mxu0 %vm552_vm0, %v2552_v36  ;;  %2440 = vmatmul.msk.bf16.vlgmr.msra.gmra.mxu2 %vm552_vm0, %v2553_v37 }
  0x3c   : > { %985 = vmatpush.bf16.msrb.mxu2 %v2427_v15  ;;  %2433 = vmatmul.msk.bf16.vlgmr.msra.gmra.mxu1 %vm552_vm0, %v2552_v36 }
  0x3d   : > { %999 = vmatpush.bf16.msrb.mxu3 %v2431_v19  ;;  %843 = vmatpush.bf16.msrb.mxu0 %v2427_v15 }
  0x3e   : > { %2441 = vmatmul.msk.bf16.vlgmr.msra.gmra.mxu3 %vm552_vm0, %v2553_v37  ;;  %857 = vmatpush.bf16.msrb.mxu1 %v2431_v19 }
  0x40   : > { %986 = vmatpush.bf16.msrb.mxu2 %v2419_v22 }
  0x41   : > { %1000 = vmatpush.bf16.msrb.mxu3 %v2423_v23  ;;  %844 = vmatpush.bf16.msrb.mxu0 %v2419_v22 }
  0x42   : > { %858 = vmatpush.bf16.msrb.mxu1 %v2423_v23 }
  0x44   : > { %987 = vmatpush.bf16.msrb.mxu2 %v2411_v28 }
  0x45   : > { %1001 = vmatpush.bf16.msrb.mxu3 %v2415_v29  ;;  %845 = vmatpush.bf16.msrb.mxu0 %v2411_v28 }
  0x46   : > { %859 = vmatpush.bf16.msrb.mxu1 %v2415_v29 }
  0x48   : > { %988 = vmatpush.bf16.msrb.mxu2 %v2403_v34 }
  0x49   : > { %1002 = vmatpush.bf16.msrb.mxu3 %v2407_v35  ;;  %846 = vmatpush.bf16.msrb.mxu0 %v2403_v34 }
  0x4a   : > { %860 = vmatpush.bf16.msrb.mxu1 %v2407_v35 }
  0x4b   : > { %2458 = vmatmul.msk.bf16.vlgmr.msrb.gmra.mxu2 %vm552_vm0, %v2555_v44 }
  0x4c   : > { %1283 = vmatpush.bf16.msra.mxu2 %v2468_v42  ;;  %2449 = vmatmul.msk.bf16.vlgmr.msrb.gmra.mxu0 %vm552_vm0, %v2554_v45 }
  0x4d   : > { %1297 = vmatpush.bf16.msra.mxu3 %v2472_v43  ;;  %1142 = vmatpush.bf16.msra.mxu0 %v2468_v42 }
  0x4e   : > { %1156 = vmatpush.bf16.msra.mxu1 %v2472_v43  ;;  %2459 = vmatmul.msk.bf16.vlgmr.msrb.gmra.mxu3 %vm552_vm0, %v2555_v44 }
  0x4f   : > { %2450 = vmatmul.msk.bf16.vlgmr.msrb.gmra.mxu1 %vm552_vm0, %v2554_v45 }
  0x50   : > { %1567 = vmatpush.bf16.msrb.mxu2 %v2468_v42 }
  0x51   : > { %1581 = vmatpush.bf16.msrb.mxu3 %v2472_v43  ;;  %1425 = vmatpush.bf16.msrb.mxu0 %v2468_v42 }
  0x52   : > { %1439 = vmatpush.bf16.msrb.mxu1 %v2472_v43 }
  0x5b   : > { %2481 = vmatmul.msk.bf16.vlgmr.msra.gmra.mxu2 %vm1131_vm1, %v2559_v46 }
  0x5c   : > { %2473 = vmatmul.msk.bf16.vlgmr.msra.gmra.mxu0 %vm1131_vm1, %v2558_v47  ;;  %1851 = vmatpush.bf16.msra.mxu2 %v2468_v42 }
  0x5d   : > { %1709 = vmatpush.bf16.msra.mxu0 %v2468_v42 }
  0x5e   : > { %2482 = vmatmul.msk.bf16.vlgmr.msra.gmra.mxu3 %vm1131_vm1, %v2559_v46 }
  0x5f   : > { %2474 = vmatmul.msk.bf16.vlgmr.msra.gmra.mxu1 %vm1131_vm1, %v2558_v47  ;;  %1865 = vmatpush.bf16.msra.mxu3 %v2472_v43 }
  0x60   : > { %1723 = vmatpush.bf16.msra.mxu1 %v2472_v43 }
  0x6b   : > { %2499 = vmatmul.msk.bf16.vlgmr.msrb.gmra.mxu2 %vm1131_vm1, %v2561_v48 }
  0x6c   : > { %2490 = vmatmul.msk.bf16.vlgmr.msrb.gmra.mxu0 %vm1131_vm1, %v2560_v49  ;;  %2135 = vmatpush.bf16.msrb.mxu2 %v2468_v42 }
  0x6d   : > { %1993 = vmatpush.bf16.msrb.mxu0 %v2468_v42 }
  0x6e   : > { %2500 = vmatmul.msk.bf16.vlgmr.msrb.gmra.mxu3 %vm1131_vm1, %v2561_v48 }
  0x6f   : > { %2491 = vmatmul.msk.bf16.vlgmr.msrb.gmra.mxu1 %vm1131_vm1, %v2560_v49  ;;  %2149 = vmatpush.bf16.msrb.mxu3 %v2472_v43 }
  0x70   : > { %2007 = vmatpush.bf16.msrb.mxu1 %v2472_v43 }
  0x7b   : > { %2517 = vmatmul.msk.bf16.vlgmr.msra.gmra.mxu2 %vm1131_vm1, %v2563_v50 }
  0x7c   : > { %2508 = vmatmul.msk.bf16.vlgmr.msra.gmra.mxu0 %vm1131_vm1, %v2562_v51 }
  0x7e   : > { %2518 = vmatmul.msk.bf16.vlgmr.msra.gmra.mxu3 %vm1131_vm1, %v2563_v50 }
  0x7f   : > { %2509 = vmatmul.msk.bf16.vlgmr.msra.gmra.mxu1 %vm1131_vm1, %v2562_v51 }
  0x8b   : > { %2535 = vmatmul.msk.bf16.vlgmr.msrb.gmra.mxu2 %vm1131_vm1, %v2565_v52 }
  0x8c   : > { %2526 = vmatmul.msk.bf16.vlgmr.msrb.gmra.mxu0 %vm1131_vm1, %v2564_v53 }
  0x8e   : > { %2536 = vmatmul.msk.bf16.vlgmr.msrb.gmra.mxu3 %vm1131_vm1, %v2565_v52 }
  0x8f   : > { %2527 = vmatmul.msk.bf16.vlgmr.msrb.gmra.mxu1 %vm1131_vm1, %v2564_v53 }
  0xb8   : > { %v565_v57 = vpop.f32.mrf.mxu0 }
  0xb9   : > { %v590_v58 = vmul.f32 %v586_v55, %v565_v57  ;;  %v579_v59 = vpop.f32.mrf.mxu1 }
  0xba   : > { %v591_v60 = vmul.f32 %v587_v56, %v579_v59 }
  0xbb   : > { %v596_v61 = vrot.slane %v590_v58, 1  ;;  %v597_v62 = vrot.slane %v590_v58, 2  ;;  %v598_v63 = vrot.slane %v590_v58, 3  ;;  %624 = vst [vmem:[%s2810_s23] sm:$0x1] %v590_v58  ;;  %v599_v0 = vrot.slane %v590_v58, 4 }
  0xbc   : > { %670 = vst [vmem:[%s2817_s29] sm:$0x1] %v591_v60  ;;  %v600_v1 = vrot.slane %v590_v58, 5  ;;  %v601_v3 = vrot.slane %v590_v58, 6  ;;  %v602_v4 = vrot.slane %v590_v58, 7  ;;  %v642_v5 = vrot.slane %v591_v60, 1 }
  0xbd   : > { %625 = vst [vmem:[%s2810_s23 + $0x10] sm:$0x1] %v596_v61  ;;  %v643_v7 = vrot.slane %v591_v60, 2  ;;  %v644_v9 = vrot.slane %v591_v60, 3  ;;  %v645_v10 = vrot.slane %v591_v60, 4  ;;  %v646_v11 = vrot.slane %v591_v60, 5 }
  0xbe   : > { %626 = vst [vmem:[%s2810_s23 + $0x20] sm:$0x1] %v597_v62  ;;  %v706_v8 = vpop.f32.mrf.mxu2  ;;  %v647_v13 = vrot.slane %v591_v60, 6  ;;  %v648_v14 = vrot.slane %v591_v60, 7 }
  0xbf   : > { %627 = vst [vmem:[%s2810_s23 + $0x30] sm:$0x1] %v598_v63  ;;  %v732_v12 = vmul.f32 %v728_v6, %v706_v8  ;;  %v2894_v60 = vld [vmem:[%s3388_s4 + $0x2] ss:$4 sm:$0x3] }
  0xc0   : > { %628 = vst [vmem:[%s2810_s23 + $0x40] sm:$0x1] %v599_v0  ;;  %v567_v27 = vpop.f32.mrf.mxu0  ;;  %v870_v63 = vperm.slane %v2894_v60, 0 }
  0xc1   : > { %629 = vst [vmem:[%s2810_s23 + $0x50] sm:$0x1] %v600_v1  ;;  %v738_v15 = vrot.slane %v732_v12, 1  ;;  %v739_v17 = vrot.slane %v732_v12, 2  ;;  %v720_v18 = vpop.f32.mrf.mxu3  ;;  %v740_v19 = vrot.slane %v732_v12, 3  ;;  %v741_v20 = vrot.slane %v732_v12, 4  ;;  %v581_v36 = vpop.f32.mrf.mxu1 }
  0xc2   : > { %630 = vst [vmem:[%s2810_s23 + $0x60] sm:$0x1] %v601_v3  ;;  %v742_v21 = vrot.slane %v732_v12, 5  ;;  %v733_v22 = vmul.f32 %v729_v16, %v720_v18  ;;  %v743_v23 = vrot.slane %v732_v12, 6  ;;  %v744_v24 = vrot.slane %v732_v12, 7 }
  0xc3   : > { %631 = vst [vmem:[%s2810_s23 + $0x70] sm:$0x1] %v602_v4  ;;  %v592_v31 = vmul.f32 %v586_v55, %v567_v27  ;;  %v593_v40 = vmul.f32 %v587_v56, %v581_v36 }
  0xc4   : > { %671 = vst [vmem:[%s2817_s29 + $0x10] sm:$0x1] %v642_v5  ;;  %v784_v25 = vrot.slane %v733_v22, 1  ;;  %v785_v26 = vrot.slane %v733_v22, 2  ;;  %v786_v28 = vrot.slane %v733_v22, 3  ;;  %v787_v29 = vrot.slane %v733_v22, 4 }
  0xc5   : > { %672 = vst [vmem:[%s2817_s29 + $0x20] sm:$0x1] %v643_v7  ;;  %v788_v30 = vrot.slane %v733_v22, 5  ;;  %v789_v32 = vrot.slane %v733_v22, 6  ;;  %v790_v33 = vrot.slane %v733_v22, 7  ;;  %v603_v34 = vrot.slane %v592_v31, 1 }
  0xc6   : > { %673 = vst [vmem:[%s2817_s29 + $0x30] sm:$0x1] %v644_v9  ;;  %v604_v35 = vrot.slane %v592_v31, 2  ;;  %v605_v37 = vrot.slane %v592_v31, 3  ;;  %v606_v38 = vrot.slane %v592_v31, 4  ;;  %v607_v39 = vrot.slane %v592_v31, 5  ;;  %v708_v45 = vpop.f32.mrf.mxu2 }
  0xc7   : > { %674 = vst [vmem:[%s2817_s29 + $0x40] sm:$0x1] %v645_v10  ;;  %v608_v41 = vrot.slane %v592_v31, 6  ;;  %v609_v42 = vrot.slane %v592_v31, 7  ;;  %v649_v43 = vrot.slane %v593_v40, 1  ;;  %v650_v44 = vrot.slane %v593_v40, 2 }
  0xc8   : > { %675 = vst [vmem:[%s2817_s29 + $0x50] sm:$0x1] %v646_v11  ;;  %v651_v46 = vrot.slane %v593_v40, 3  ;;  %v652_v47 = vrot.slane %v593_v40, 4  ;;  %v653_v48 = vrot.slane %v593_v40, 5  ;;  %v734_v49 = vmul.f32 %v728_v6, %v708_v45 }
  0xc9   : > { %676 = vst [vmem:[%s2817_s29 + $0x60] sm:$0x1] %v647_v13  ;;  %v654_v50 = vrot.slane %v593_v40, 6  ;;  %v655_v51 = vrot.slane %v593_v40, 7  ;;  %v722_v54 = vpop.f32.mrf.mxu3  ;;  %v848_v3 = vpop.f32.mrf.mxu0  ;;  %v871_v9 = vperm.slane %v2894_v60, 1 }
  0xca   : > { %677 = vst [vmem:[%s2817_s29 + $0x70] sm:$0x1] %v648_v14  ;;  %v745_v52 = vrot.slane %v734_v49, 1  ;;  %v746_v53 = vrot.slane %v734_v49, 2  ;;  %v747_v55 = vrot.slane %v734_v49, 3  ;;  %v748_v56 = vrot.slane %v734_v49, 4 }
  0xcb   : > { %766 = vst [vmem:[%s2810_s23 + $0x1] sm:$0x1] %v732_v12  ;;  %v749_v57 = vrot.slane %v734_v49, 5  ;;  %v735_v58 = vmul.f32 %v729_v16, %v722_v54  ;;  %v750_v59 = vrot.slane %v734_v49, 6  ;;  %v751_v61 = vrot.slane %v734_v49, 7 }
  0xcc   : > { %767 = vst [vmem:[%s2810_s23 + $0x11] sm:$0x1] %v738_v15  ;;  %v874_v5 = vmul.f32 %v870_v63, %v848_v3  ;;  %v862_v13 = vpop.f32.mrf.mxu1 }
  0xcd   : > { %768 = vst [vmem:[%s2810_s23 + $0x21] sm:$0x1] %v739_v17  ;;  %v791_v62 = vrot.slane %v735_v58, 1  ;;  %v792_v0 = vrot.slane %v735_v58, 2  ;;  %v793_v1 = vrot.slane %v735_v58, 3  ;;  %v794_v2 = vrot.slane %v735_v58, 4 }
  0xce   : > { %769 = vst [vmem:[%s2810_s23 + $0x31] sm:$0x1] %v740_v19  ;;  %v795_v4 = vrot.slane %v735_v58, 5  ;;  %v796_v6 = vrot.slane %v735_v58, 6  ;;  %v797_v7 = vrot.slane %v735_v58, 7  ;;  %v880_v8 = vrot.slane %v874_v5, 1 }
  0xcf   : > { %770 = vst [vmem:[%s2810_s23 + $0x41] sm:$0x1] %v741_v20  ;;  %v881_v10 = vrot.slane %v874_v5, 2  ;;  %v882_v11 = vrot.slane %v874_v5, 3  ;;  %v883_v12 = vrot.slane %v874_v5, 4  ;;  %v884_v14 = vrot.slane %v874_v5, 5 }
  0xd0   : > { %771 = vst [vmem:[%s2810_s23 + $0x51] sm:$0x1] %v742_v21  ;;  %v875_v15 = vmul.f32 %v871_v9, %v862_v13  ;;  %v885_v16 = vrot.slane %v874_v5, 6  ;;  %v2921_v17 = vld [vmem:[%s3388_s4 + $0x3] ss:$4 sm:$0x3] }
  0xd1   : > { %772 = vst [vmem:[%s2810_s23 + $0x61] sm:$0x1] %v743_v23  ;;  %v886_v18 = vrot.slane %v874_v5, 7  ;;  %v1012_v20 = vperm.slane %v2921_v17, 0 }
  0xd2   : > { %773 = vst [vmem:[%s2810_s23 + $0x71] sm:$0x1] %v744_v24  ;;  %v926_v19 = vrot.slane %v875_v15, 1  ;;  %v927_v21 = vrot.slane %v875_v15, 2  ;;  %v928_v23 = vrot.slane %v875_v15, 3  ;;  %v929_v24 = vrot.slane %v875_v15, 4 }
  0xd3   : > { %812 = vst [vmem:[%s2817_s29 + $0x1] sm:$0x1] %v733_v22  ;;  %v990_v22 = vpop.f32.mrf.mxu2  ;;  %v931_v27 = vrot.slane %v875_v15, 6 }
  0xd4   : > { %813 = vst [vmem:[%s2817_s29 + $0x11] sm:$0x1] %v784_v25  ;;  %v930_v25 = vrot.slane %v875_v15, 5 }
  0xd5   : > { %814 = vst [vmem:[%s2817_s29 + $0x21] sm:$0x1] %v785_v26  ;;  %v1016_v26 = vmul.f32 %v1012_v20, %v990_v22 }
  0xd6   : > { %815 = vst [vmem:[%s2817_s29 + $0x31] sm:$0x1] %v786_v28  ;;  %v932_v28 = vrot.slane %v875_v15, 7 }
  0xd7   : > { %816 = vst [vmem:[%s2817_s29 + $0x41] sm:$0x1] %v787_v29  ;;  %v1022_v29 = vrot.slane %v1016_v26, 1 }
  0xd8   : > { %817 = vst [vmem:[%s2817_s29 + $0x51] sm:$0x1] %v788_v30  ;;  %v1013_v30 = vperm.slane %v2921_v17, 1 }
  0xd9   : > { %818 = vst [vmem:[%s2817_s29 + $0x61] sm:$0x1] %v789_v32  ;;  %v1004_v32 = vpop.f32.mrf.mxu3 }
  0xda   : > { %819 = vst [vmem:[%s2817_s29 + $0x71] sm:$0x1] %v790_v33  ;;  %v1024_v33 = vrot.slane %v1016_v26, 3  ;;  %v1017_v36 = vmul.f32 %v1013_v30, %v1004_v32 }
  0xdb   : > { %632 = vst [vmem:[%s2810_s23 + $0x80] sm:$0x1] %v592_v31  ;;  %v1023_v31 = vrot.slane %v1016_v26, 2 }
  0xdc   : > { %633 = vst [vmem:[%s2810_s23 + $0x90] sm:$0x1] %v603_v34  ;;  %v1025_v34 = vrot.slane %v1016_v26, 4 }
  0xdd   : > { %634 = vst [vmem:[%s2810_s23 + $0xa0] sm:$0x1] %v604_v35  ;;  %v1026_v35 = vrot.slane %v1016_v26, 5 }
  0xde   : > { %635 = vst [vmem:[%s2810_s23 + $0xb0] sm:$0x1] %v605_v37  ;;  %v1027_v37 = vrot.slane %v1016_v26, 6 }
  0xdf   : > { %636 = vst [vmem:[%s2810_s23 + $0xc0] sm:$0x1] %v606_v38  ;;  %v1028_v38 = vrot.slane %v1016_v26, 7 }
  0xe0   : > { %637 = vst [vmem:[%s2810_s23 + $0xd0] sm:$0x1] %v607_v39  ;;  %v1068_v39 = vrot.slane %v1017_v36, 1 }
  0xe1   : > { %638 = vst [vmem:[%s2810_s23 + $0xe0] sm:$0x1] %v608_v41  ;;  %v850_v41 = vpop.f32.mrf.mxu0 }
  0xe2   : > { %639 = vst [vmem:[%s2810_s23 + $0xf0] sm:$0x1] %v609_v42  ;;  %v1070_v42 = vrot.slane %v1017_v36, 3  ;;  %v876_v45 = vmul.f32 %v870_v63, %v850_v41 }
  0xe3   : > { %678 = vst [vmem:[%s2817_s29 + $0x80] sm:$0x1] %v593_v40  ;;  %v1069_v40 = vrot.slane %v1017_v36, 2 }
  0xe4   : > { %679 = vst [vmem:[%s2817_s29 + $0x90] sm:$0x1] %v649_v43  ;;  %v1071_v43 = vrot.slane %v1017_v36, 4 }
  0xe5   : > { %680 = vst [vmem:[%s2817_s29 + $0xa0] sm:$0x1] %v650_v44  ;;  %v1072_v44 = vrot.slane %v1017_v36, 5 }
  0xe6   : > { %681 = vst [vmem:[%s2817_s29 + $0xb0] sm:$0x1] %v651_v46  ;;  %v1073_v46 = vrot.slane %v1017_v36, 6 }
  0xe7   : > { %682 = vst [vmem:[%s2817_s29 + $0xc0] sm:$0x1] %v652_v47  ;;  %v1074_v47 = vrot.slane %v1017_v36, 7 }
  0xe8   : > { %683 = vst [vmem:[%s2817_s29 + $0xd0] sm:$0x1] %v653_v48  ;;  %v887_v48 = vrot.slane %v876_v45, 1 }
  0xe9   : > { %684 = vst [vmem:[%s2817_s29 + $0xe0] sm:$0x1] %v654_v50  ;;  %v864_v50 = vpop.f32.mrf.mxu1  ;;  %v1144_v17 = vpop.f32.mrf.mxu0 }
  0xea   : > { %685 = vst [vmem:[%s2817_s29 + $0xf0] sm:$0x1] %v655_v51  ;;  %v889_v51 = vrot.slane %v876_v45, 3  ;;  %v877_v54 = vmul.f32 %v871_v9, %v864_v50 }
  0xeb   : > { %774 = vst [vmem:[%s2810_s23 + $0x81] sm:$0x1] %v734_v49  ;;  %v888_v49 = vrot.slane %v876_v45, 2 }
  0xec   : > { %775 = vst [vmem:[%s2810_s23 + $0x91] sm:$0x1] %v745_v52  ;;  %v890_v52 = vrot.slane %v876_v45, 4  ;;  %v936_v60 = vrot.slane %v877_v54, 4 }
  0xed   : > { %776 = vst [vmem:[%s2810_s23 + $0xa1] sm:$0x1] %v746_v53  ;;  %v891_v53 = vrot.slane %v876_v45, 5 }
  0xee   : > { %777 = vst [vmem:[%s2810_s23 + $0xb1] sm:$0x1] %v747_v55  ;;  %v892_v55 = vrot.slane %v876_v45, 6 }
  0xef   : > { %778 = vst [vmem:[%s2810_s23 + $0xc1] sm:$0x1] %v748_v56  ;;  %v893_v56 = vrot.slane %v876_v45, 7 }
  0xf0   : > { %779 = vst [vmem:[%s2810_s23 + $0xd1] sm:$0x1] %v749_v57  ;;  %v933_v57 = vrot.slane %v877_v54, 1 }
  0xf1   : > { %780 = vst [vmem:[%s2810_s23 + $0xe1] sm:$0x1] %v750_v59  ;;  %v992_v59 = vpop.f32.mrf.mxu2 }
  0xf2   : > { %781 = vst [vmem:[%s2810_s23 + $0xf1] sm:$0x1] %v751_v61  ;;  %v935_v61 = vrot.slane %v877_v54, 3  ;;  %v1018_v63 = vmul.f32 %v1012_v20, %v992_v59 }
  0xf3   : > { %820 = vst [vmem:[%s2817_s29 + $0x81] sm:$0x1] %v735_v58  ;;  %v934_v58 = vrot.slane %v877_v54, 2 }
  0xf4   : > { %821 = vst [vmem:[%s2817_s29 + $0x91] sm:$0x1] %v791_v62  ;;  %v937_v62 = vrot.slane %v877_v54, 5  ;;  %v1030_v3 = vrot.slane %v1018_v63, 2  ;;  %v1034_v9 = vrot.slane %v1018_v63, 6 }
  0xf5   : > { %822 = vst [vmem:[%s2817_s29 + $0xa1] sm:$0x1] %v792_v0  ;;  %v938_v0 = vrot.slane %v877_v54, 6 }
  0xf6   : > { %823 = vst [vmem:[%s2817_s29 + $0xb1] sm:$0x1] %v793_v1  ;;  %v939_v1 = vrot.slane %v877_v54, 7 }
  0xf7   : > { %824 = vst [vmem:[%s2817_s29 + $0xc1] sm:$0x1] %v794_v2  ;;  %v1029_v2 = vrot.slane %v1018_v63, 1 }
  0xf8   : > { %825 = vst [vmem:[%s2817_s29 + $0xd1] sm:$0x1] %v795_v4  ;;  %v1006_v4 = vpop.f32.mrf.mxu3 }
  0xf9   : > { %826 = vst [vmem:[%s2817_s29 + $0xe1] sm:$0x1] %v796_v6  ;;  %v1032_v6 = vrot.slane %v1018_v63, 4 }
  0xfa   : > { %827 = vst [vmem:[%s2817_s29 + $0xf1] sm:$0x1] %v797_v7  ;;  %v1033_v7 = vrot.slane %v1018_v63, 5 }
  0xfb   : > { %908 = vst [vmem:[%s2810_s23 + $0x2] sm:$0x1] %v874_v5  ;;  %v1031_v5 = vrot.slane %v1018_v63, 3 }
  0xfc   : > { %909 = vst [vmem:[%s2810_s23 + $0x12] sm:$0x1] %v880_v8  ;;  %v1019_v8 = vmul.f32 %v1013_v30, %v1006_v4 }
  0xfd   : > { %910 = vst [vmem:[%s2810_s23 + $0x22] sm:$0x1] %v881_v10  ;;  %v2988_v10 = vld [vmem:[%s3389_s5] ss:$8 sm:$0x3] }
  0xfe   : > { %911 = vst [vmem:[%s2810_s23 + $0x32] sm:$0x1] %v882_v11  ;;  %v1035_v11 = vrot.slane %v1018_v63, 7  ;;  %v1165_v13 = vperm.slane %v2988_v10, 0  ;;  %v1080_v20 = vrot.slane %v1019_v8, 6 }
  0xff   : > { %912 = vst [vmem:[%s2810_s23 + $0x42] sm:$0x1] %v883_v12  ;;  %v1075_v12 = vrot.slane %v1019_v8, 1 }
 0x100   : > { %913 = vst [vmem:[%s2810_s23 + $0x52] sm:$0x1] %v884_v14  ;;  %v1076_v14 = vrot.slane %v1019_v8, 2 }
 0x101   : > { %914 = vst [vmem:[%s2810_s23 + $0x62] sm:$0x1] %v885_v16  ;;  %v1078_v16 = vrot.slane %v1019_v8, 4 }
 0x102   : > { %915 = vst [vmem:[%s2810_s23 + $0x72] sm:$0x1] %v886_v18  ;;  %v1079_v18 = vrot.slane %v1019_v8, 5 }
 0x103   : > { %954 = vst [vmem:[%s2817_s29 + $0x2] sm:$0x1] %v875_v15  ;;  %v1077_v15 = vrot.slane %v1019_v8, 3 }
 0x104   : > { %955 = vst [vmem:[%s2817_s29 + $0x12] sm:$0x1] %v926_v19  ;;  %v1169_v19 = vmul.f32 %v1165_v13, %v1144_v17 }
 0x105   : > { %956 = vst [vmem:[%s2817_s29 + $0x22] sm:$0x1] %v927_v21  ;;  %v1081_v21 = vrot.slane %v1019_v8, 7 }
 0x106   : > { %957 = vst [vmem:[%s2817_s29 + $0x32] sm:$0x1] %v928_v23  ;;  %v1175_v22 = vrot.slane %v1169_v19, 1  ;;  %v1166_v23 = vperm.slane %v2988_v10, 1  ;;  %v1180_v30 = vrot.slane %v1169_v19, 6  ;;  %v1181_v32 = vrot.slane %v1169_v19, 7 }
 0x107   : > { %958 = vst [vmem:[%s2817_s29 + $0x42] sm:$0x1] %v929_v24  ;;  %v1176_v24 = vrot.slane %v1169_v19, 2 }
 0x108   : > { %959 = vst [vmem:[%s2817_s29 + $0x52] sm:$0x1] %v930_v25  ;;  %v1177_v25 = vrot.slane %v1169_v19, 3 }
 0x109   : > { %960 = vst [vmem:[%s2817_s29 + $0x62] sm:$0x1] %v931_v27  ;;  %v1158_v27 = vpop.f32.mrf.mxu1 }
 0x10a   : > { %961 = vst [vmem:[%s2817_s29 + $0x72] sm:$0x1] %v932_v28  ;;  %v1179_v28 = vrot.slane %v1169_v19, 5 }
 0x10b   : > { %1050 = vst [vmem:[%s2810_s23 + $0x3] sm:$0x1] %v1016_v26  ;;  %v1178_v26 = vrot.slane %v1169_v19, 4 }
 0x10c   : > { %1051 = vst [vmem:[%s2810_s23 + $0x13] sm:$0x1] %v1022_v29  ;;  %v1170_v29 = vmul.f32 %v1166_v23, %v1158_v27 }
 0x10d   : > { %1052 = vst [vmem:[%s2810_s23 + $0x23] sm:$0x1] %v1023_v31  ;;  %v3015_v31 = vld [vmem:[%s3389_s5 + $0x1] ss:$8 sm:$0x3] }
 0x10e   : > { %1053 = vst [vmem:[%s2810_s23 + $0x33] sm:$0x1] %v1024_v33  ;;  %v1221_v33 = vrot.slane %v1170_v29, 1  ;;  %v1226_v41 = vrot.slane %v1170_v29, 6 }
 0x10f   : > { %1054 = vst [vmem:[%s2810_s23 + $0x43] sm:$0x1] %v1025_v34  ;;  %v1307_v34 = vperm.slane %v3015_v31, 0 }
 0x110   : > { %1055 = vst [vmem:[%s2810_s23 + $0x53] sm:$0x1] %v1026_v35  ;;  %v1222_v35 = vrot.slane %v1170_v29, 2 }
 0x111   : > { %1056 = vst [vmem:[%s2810_s23 + $0x63] sm:$0x1] %v1027_v37  ;;  %v1223_v37 = vrot.slane %v1170_v29, 3 }
 0x112   : > { %1057 = vst [vmem:[%s2810_s23 + $0x73] sm:$0x1] %v1028_v38  ;;  %v1224_v38 = vrot.slane %v1170_v29, 4 }
 0x113   : > { %1096 = vst [vmem:[%s2817_s29 + $0x3] sm:$0x1] %v1017_v36  ;;  %v1285_v36 = vpop.f32.mrf.mxu2 }
 0x114   : > { %1097 = vst [vmem:[%s2817_s29 + $0x13] sm:$0x1] %v1068_v39  ;;  %v1225_v39 = vrot.slane %v1170_v29, 5 }
 0x115   : > { %1098 = vst [vmem:[%s2817_s29 + $0x23] sm:$0x1] %v1069_v40  ;;  %v1311_v40 = vmul.f32 %v1307_v34, %v1285_v36 }
 0x116   : > { %1099 = vst [vmem:[%s2817_s29 + $0x33] sm:$0x1] %v1070_v42  ;;  %v1227_v42 = vrot.slane %v1170_v29, 7 }
 0x117   : > { %1100 = vst [vmem:[%s2817_s29 + $0x43] sm:$0x1] %v1071_v43  ;;  %v1317_v43 = vrot.slane %v1311_v40, 1 }
 0x118   : > { %1101 = vst [vmem:[%s2817_s29 + $0x53] sm:$0x1] %v1072_v44  ;;  %v1308_v44 = vperm.slane %v3015_v31, 1 }
 0x119   : > { %1102 = vst [vmem:[%s2817_s29 + $0x63] sm:$0x1] %v1073_v46  ;;  %v1299_v46 = vpop.f32.mrf.mxu3 }
 0x11a   : > { %1103 = vst [vmem:[%s2817_s29 + $0x73] sm:$0x1] %v1074_v47  ;;  %v1319_v47 = vrot.slane %v1311_v40, 3  ;;  %v1312_v50 = vmul.f32 %v1308_v44, %v1299_v46 }
 0x11b   : > { %916 = vst [vmem:[%s2810_s23 + $0x82] sm:$0x1] %v876_v45  ;;  %v1318_v45 = vrot.slane %v1311_v40, 2 }
 0x11c   : > { %917 = vst [vmem:[%s2810_s23 + $0x92] sm:$0x1] %v887_v48  ;;  %v1320_v48 = vrot.slane %v1311_v40, 4 }
 0x11d   : > { %918 = vst [vmem:[%s2810_s23 + $0xa2] sm:$0x1] %v888_v49  ;;  %v1321_v49 = vrot.slane %v1311_v40, 5 }
 0x11e   : > { %919 = vst [vmem:[%s2810_s23 + $0xb2] sm:$0x1] %v889_v51  ;;  %v1322_v51 = vrot.slane %v1311_v40, 6 }
 0x11f   : > { %920 = vst [vmem:[%s2810_s23 + $0xc2] sm:$0x1] %v890_v52  ;;  %v1323_v52 = vrot.slane %v1311_v40, 7 }
 0x120   : > { %921 = vst [vmem:[%s2810_s23 + $0xd2] sm:$0x1] %v891_v53  ;;  %v1363_v53 = vrot.slane %v1312_v50, 1 }
 0x121   : > { %922 = vst [vmem:[%s2810_s23 + $0xe2] sm:$0x1] %v892_v55  ;;  %v1146_v55 = vpop.f32.mrf.mxu0 }
 0x122   : > { %923 = vst [vmem:[%s2810_s23 + $0xf2] sm:$0x1] %v893_v56  ;;  %v1365_v56 = vrot.slane %v1312_v50, 3  ;;  %v1171_v59 = vmul.f32 %v1165_v13, %v1146_v55 }
 0x123   : > { %962 = vst [vmem:[%s2817_s29 + $0x82] sm:$0x1] %v877_v54  ;;  %v1364_v54 = vrot.slane %v1312_v50, 2 }
 0x124   : > { %963 = vst [vmem:[%s2817_s29 + $0x92] sm:$0x1] %v933_v57  ;;  %v1366_v57 = vrot.slane %v1312_v50, 4 }
 0x125   : > { %964 = vst [vmem:[%s2817_s29 + $0xa2] sm:$0x1] %v934_v58  ;;  %v1367_v58 = vrot.slane %v1312_v50, 5 }
 0x126   : > { %965 = vst [vmem:[%s2817_s29 + $0xb2] sm:$0x1] %v935_v61  ;;  %v1368_v61 = vrot.slane %v1312_v50, 6 }
 0x127   : > { %966 = vst [vmem:[%s2817_s29 + $0xc2] sm:$0x1] %v936_v60  ;;  %v1369_v60 = vrot.slane %v1312_v50, 7 }
 0x128   : > { %967 = vst [vmem:[%s2817_s29 + $0xd2] sm:$0x1] %v937_v62  ;;  %v1182_v62 = vrot.slane %v1171_v59, 1 }
 0x129   : > { %968 = vst [vmem:[%s2817_s29 + $0xe2] sm:$0x1] %v938_v0  ;;  %v1160_v0 = vpop.f32.mrf.mxu1  ;;  %v1427_v31 = vpop.f32.mrf.mxu0 }
 0x12a   : > { %969 = vst [vmem:[%s2817_s29 + $0xf2] sm:$0x1] %v939_v1  ;;  %v1184_v1 = vrot.slane %v1171_v59, 3  ;;  %v1172_v4 = vmul.f32 %v1166_v23, %v1160_v0 }
 0x12b   : > { %1058 = vst [vmem:[%s2810_s23 + $0x83] sm:$0x1] %v1018_v63  ;;  %v1183_v63 = vrot.slane %v1171_v59, 2 }
 0x12c   : > { %1059 = vst [vmem:[%s2810_s23 + $0x93] sm:$0x1] %v1029_v2  ;;  %v1185_v2 = vrot.slane %v1171_v59, 4  ;;  %v1231_v10 = vrot.slane %v1172_v4, 4 }
 0x12d   : > { %1060 = vst [vmem:[%s2810_s23 + $0xa3] sm:$0x1] %v1030_v3  ;;  %v1186_v3 = vrot.slane %v1171_v59, 5 }
 0x12e   : > { %1061 = vst [vmem:[%s2810_s23 + $0xb3] sm:$0x1] %v1031_v5  ;;  %v1187_v5 = vrot.slane %v1171_v59, 6 }
 0x12f   : > { %1062 = vst [vmem:[%s2810_s23 + $0xc3] sm:$0x1] %v1032_v6  ;;  %v1188_v6 = vrot.slane %v1171_v59, 7 }
 0x130   : > { %1063 = vst [vmem:[%s2810_s23 + $0xd3] sm:$0x1] %v1033_v7  ;;  %v1228_v7 = vrot.slane %v1172_v4, 1 }
 0x131   : > { %1064 = vst [vmem:[%s2810_s23 + $0xe3] sm:$0x1] %v1034_v9  ;;  %v1287_v9 = vpop.f32.mrf.mxu2 }
 0x132   : > { %1065 = vst [vmem:[%s2810_s23 + $0xf3] sm:$0x1] %v1035_v11  ;;  %v1230_v11 = vrot.slane %v1172_v4, 3  ;;  %v1313_v13 = vmul.f32 %v1307_v34, %v1287_v9 }
 0x133   : > { %1104 = vst [vmem:[%s2817_s29 + $0x83] sm:$0x1] %v1019_v8  ;;  %v1229_v8 = vrot.slane %v1172_v4, 2 }
 0x134   : > { %1105 = vst [vmem:[%s2817_s29 + $0x93] sm:$0x1] %v1075_v12  ;;  %v1232_v12 = vrot.slane %v1172_v4, 5  ;;  %v1325_v17 = vrot.slane %v1313_v13, 2  ;;  %v1329_v23 = vrot.slane %v1313_v13, 6 }
 0x135   : > { %1106 = vst [vmem:[%s2817_s29 + $0xa3] sm:$0x1] %v1076_v14  ;;  %v1233_v14 = vrot.slane %v1172_v4, 6 }
 0x136   : > { %1107 = vst [vmem:[%s2817_s29 + $0xb3] sm:$0x1] %v1077_v15  ;;  %v1234_v15 = vrot.slane %v1172_v4, 7 }
 0x137   : > { %1108 = vst [vmem:[%s2817_s29 + $0xc3] sm:$0x1] %v1078_v16  ;;  %v1324_v16 = vrot.slane %v1313_v13, 1 }
 0x138   : > { %1109 = vst [vmem:[%s2817_s29 + $0xd3] sm:$0x1] %v1079_v18  ;;  %v1301_v18 = vpop.f32.mrf.mxu3 }
 0x139   : > { %1110 = vst [vmem:[%s2817_s29 + $0xe3] sm:$0x1] %v1080_v20  ;;  %v1327_v20 = vrot.slane %v1313_v13, 4 }
 0x13a   : > { %1111 = vst [vmem:[%s2817_s29 + $0xf3] sm:$0x1] %v1081_v21  ;;  %v1328_v21 = vrot.slane %v1313_v13, 5 }
 0x13b   : > { %1203 = vst [vmem:[%s2810_s23 + $0x4] sm:$0x1] %v1169_v19  ;;  %v1326_v19 = vrot.slane %v1313_v13, 3 }
 0x13c   : > { %1204 = vst [vmem:[%s2810_s23 + $0x14] sm:$0x1] %v1175_v22  ;;  %v1314_v22 = vmul.f32 %v1308_v44, %v1301_v18 }
 0x13d   : > { %1205 = vst [vmem:[%s2810_s23 + $0x24] sm:$0x1] %v1176_v24  ;;  %v3082_v24 = vld [vmem:[%s3389_s5 + $0x2] ss:$8 sm:$0x3] }
 0x13e   : > { %1206 = vst [vmem:[%s2810_s23 + $0x34] sm:$0x1] %v1177_v25  ;;  %v1330_v25 = vrot.slane %v1313_v13, 7  ;;  %v1449_v27 = vperm.slane %v3082_v24, 0  ;;  %v1375_v34 = vrot.slane %v1314_v22, 6 }
 0x13f   : > { %1207 = vst [vmem:[%s2810_s23 + $0x44] sm:$0x1] %v1178_v26  ;;  %v1370_v26 = vrot.slane %v1314_v22, 1 }
 0x140   : > { %1208 = vst [vmem:[%s2810_s23 + $0x54] sm:$0x1] %v1179_v28  ;;  %v1371_v28 = vrot.slane %v1314_v22, 2 }
 0x141   : > { %1209 = vst [vmem:[%s2810_s23 + $0x64] sm:$0x1] %v1180_v30  ;;  %v1373_v30 = vrot.slane %v1314_v22, 4 }
 0x142   : > { %1210 = vst [vmem:[%s2810_s23 + $0x74] sm:$0x1] %v1181_v32  ;;  %v1374_v32 = vrot.slane %v1314_v22, 5 }
 0x143   : > { %1249 = vst [vmem:[%s2817_s29 + $0x4] sm:$0x1] %v1170_v29  ;;  %v1372_v29 = vrot.slane %v1314_v22, 3 }
 0x144   : > { %1250 = vst [vmem:[%s2817_s29 + $0x14] sm:$0x1] %v1221_v33  ;;  %v1453_v33 = vmul.f32 %v1449_v27, %v1427_v31 }
 0x145   : > { %1251 = vst [vmem:[%s2817_s29 + $0x24] sm:$0x1] %v1222_v35  ;;  %v1376_v35 = vrot.slane %v1314_v22, 7 }
 0x146   : > { %1252 = vst [vmem:[%s2817_s29 + $0x34] sm:$0x1] %v1223_v37  ;;  %v1459_v36 = vrot.slane %v1453_v33, 1  ;;  %v1450_v37 = vperm.slane %v3082_v24, 1  ;;  %v1464_v44 = vrot.slane %v1453_v33, 6  ;;  %v1465_v46 = vrot.slane %v1453_v33, 7 }
 0x147   : > { %1253 = vst [vmem:[%s2817_s29 + $0x44] sm:$0x1] %v1224_v38  ;;  %v1460_v38 = vrot.slane %v1453_v33, 2 }
 0x148   : > { %1254 = vst [vmem:[%s2817_s29 + $0x54] sm:$0x1] %v1225_v39  ;;  %v1461_v39 = vrot.slane %v1453_v33, 3 }
 0x149   : > { %1255 = vst [vmem:[%s2817_s29 + $0x64] sm:$0x1] %v1226_v41  ;;  %v1441_v41 = vpop.f32.mrf.mxu1 }
 0x14a   : > { %1256 = vst [vmem:[%s2817_s29 + $0x74] sm:$0x1] %v1227_v42  ;;  %v1463_v42 = vrot.slane %v1453_v33, 5 }
 0x14b   : > { %1345 = vst [vmem:[%s2810_s23 + $0x5] sm:$0x1] %v1311_v40  ;;  %v1462_v40 = vrot.slane %v1453_v33, 4 }
 0x14c   : > { %1346 = vst [vmem:[%s2810_s23 + $0x15] sm:$0x1] %v1317_v43  ;;  %v1454_v43 = vmul.f32 %v1450_v37, %v1441_v41 }
 0x14d   : > { %1347 = vst [vmem:[%s2810_s23 + $0x25] sm:$0x1] %v1318_v45  ;;  %v3109_v45 = vld [vmem:[%s3389_s5 + $0x3] ss:$8 sm:$0x3] }
 0x14e   : > { %1348 = vst [vmem:[%s2810_s23 + $0x35] sm:$0x1] %v1319_v47  ;;  %v1505_v47 = vrot.slane %v1454_v43, 1  ;;  %v1510_v55 = vrot.slane %v1454_v43, 6 }
 0x14f   : > { %1349 = vst [vmem:[%s2810_s23 + $0x45] sm:$0x1] %v1320_v48  ;;  %v1591_v48 = vperm.slane %v3109_v45, 0 }
 0x150   : > { %1350 = vst [vmem:[%s2810_s23 + $0x55] sm:$0x1] %v1321_v49  ;;  %v1506_v49 = vrot.slane %v1454_v43, 2 }
 0x151   : > { %1351 = vst [vmem:[%s2810_s23 + $0x65] sm:$0x1] %v1322_v51  ;;  %v1507_v51 = vrot.slane %v1454_v43, 3 }
 0x152   : > { %1352 = vst [vmem:[%s2810_s23 + $0x75] sm:$0x1] %v1323_v52  ;;  %v1508_v52 = vrot.slane %v1454_v43, 4 }
 0x153   : > { %1391 = vst [vmem:[%s2817_s29 + $0x5] sm:$0x1] %v1312_v50  ;;  %v1569_v50 = vpop.f32.mrf.mxu2 }
 0x154   : > { %1392 = vst [vmem:[%s2817_s29 + $0x15] sm:$0x1] %v1363_v53  ;;  %v1509_v53 = vrot.slane %v1454_v43, 5 }
 0x155   : > { %1393 = vst [vmem:[%s2817_s29 + $0x25] sm:$0x1] %v1364_v54  ;;  %v1595_v54 = vmul.f32 %v1591_v48, %v1569_v50 }
 0x156   : > { %1394 = vst [vmem:[%s2817_s29 + $0x35] sm:$0x1] %v1365_v56  ;;  %v1511_v56 = vrot.slane %v1454_v43, 7 }
 0x157   : > { %1395 = vst [vmem:[%s2817_s29 + $0x45] sm:$0x1] %v1366_v57  ;;  %v1601_v57 = vrot.slane %v1595_v54, 1 }
 0x158   : > { %1396 = vst [vmem:[%s2817_s29 + $0x55] sm:$0x1] %v1367_v58  ;;  %v1592_v58 = vperm.slane %v3109_v45, 1 }
 0x159   : > { %1397 = vst [vmem:[%s2817_s29 + $0x65] sm:$0x1] %v1368_v61  ;;  %v1583_v61 = vpop.f32.mrf.mxu3 }
 0x15a   : > { %1398 = vst [vmem:[%s2817_s29 + $0x75] sm:$0x1] %v1369_v60  ;;  %v1603_v60 = vrot.slane %v1595_v54, 3  ;;  %v1596_v0 = vmul.f32 %v1592_v58, %v1583_v61 }
 0x15b   : > { %1211 = vst [vmem:[%s2810_s23 + $0x84] sm:$0x1] %v1171_v59  ;;  %v1602_v59 = vrot.slane %v1595_v54, 2 }
 0x15c   : > { %1212 = vst [vmem:[%s2810_s23 + $0x94] sm:$0x1] %v1182_v62  ;;  %v1604_v62 = vrot.slane %v1595_v54, 4 }
 0x15d   : > { %1213 = vst [vmem:[%s2810_s23 + $0xa4] sm:$0x1] %v1183_v63  ;;  %v1605_v63 = vrot.slane %v1595_v54, 5 }
 0x15e   : > { %1214 = vst [vmem:[%s2810_s23 + $0xb4] sm:$0x1] %v1184_v1  ;;  %v1606_v1 = vrot.slane %v1595_v54, 6 }
 0x15f   : > { %1215 = vst [vmem:[%s2810_s23 + $0xc4] sm:$0x1] %v1185_v2  ;;  %v1607_v2 = vrot.slane %v1595_v54, 7 }
 0x160   : > { %1216 = vst [vmem:[%s2810_s23 + $0xd4] sm:$0x1] %v1186_v3  ;;  %v1647_v3 = vrot.slane %v1596_v0, 1 }
 0x161   : > { %1217 = vst [vmem:[%s2810_s23 + $0xe4] sm:$0x1] %v1187_v5  ;;  %v1429_v5 = vpop.f32.mrf.mxu0 }
 0x162   : > { %1218 = vst [vmem:[%s2810_s23 + $0xf4] sm:$0x1] %v1188_v6  ;;  %v1649_v6 = vrot.slane %v1596_v0, 3  ;;  %v1455_v9 = vmul.f32 %v1449_v27, %v1429_v5 }
 0x163   : > { %1257 = vst [vmem:[%s2817_s29 + $0x84] sm:$0x1] %v1172_v4  ;;  %v1648_v4 = vrot.slane %v1596_v0, 2 }
 0x164   : > { %1258 = vst [vmem:[%s2817_s29 + $0x94] sm:$0x1] %v1228_v7  ;;  %v1650_v7 = vrot.slane %v1596_v0, 4 }
 0x165   : > { %1259 = vst [vmem:[%s2817_s29 + $0xa4] sm:$0x1] %v1229_v8  ;;  %v1651_v8 = vrot.slane %v1596_v0, 5 }
 0x166   : > { %1260 = vst [vmem:[%s2817_s29 + $0xb4] sm:$0x1] %v1230_v11  ;;  %v1652_v11 = vrot.slane %v1596_v0, 6 }
 0x167   : > { %1261 = vst [vmem:[%s2817_s29 + $0xc4] sm:$0x1] %v1231_v10  ;;  %v1653_v10 = vrot.slane %v1596_v0, 7 }
 0x168   : > { %1262 = vst [vmem:[%s2817_s29 + $0xd4] sm:$0x1] %v1232_v12  ;;  %v1466_v12 = vrot.slane %v1455_v9, 1 }
 0x169   : > { %1263 = vst [vmem:[%s2817_s29 + $0xe4] sm:$0x1] %v1233_v14  ;;  %v1443_v14 = vpop.f32.mrf.mxu1  ;;  %v1711_v45 = vpop.f32.mrf.mxu0 }
 0x16a   : > { %1264 = vst [vmem:[%s2817_s29 + $0xf4] sm:$0x1] %v1234_v15  ;;  %v1468_v15 = vrot.slane %v1455_v9, 3  ;;  %v1456_v18 = vmul.f32 %v1450_v37, %v1443_v14 }
 0x16b   : > { %1353 = vst [vmem:[%s2810_s23 + $0x85] sm:$0x1] %v1313_v13  ;;  %v1467_v13 = vrot.slane %v1455_v9, 2 }
 0x16c   : > { %1354 = vst [vmem:[%s2810_s23 + $0x95] sm:$0x1] %v1324_v16  ;;  %v1469_v16 = vrot.slane %v1455_v9, 4  ;;  %v1515_v24 = vrot.slane %v1456_v18, 4 }
 0x16d   : > { %1355 = vst [vmem:[%s2810_s23 + $0xa5] sm:$0x1] %v1325_v17  ;;  %v1470_v17 = vrot.slane %v1455_v9, 5 }
 0x16e   : > { %1356 = vst [vmem:[%s2810_s23 + $0xb5] sm:$0x1] %v1326_v19  ;;  %v1471_v19 = vrot.slane %v1455_v9, 6 }
 0x16f   : > { %1357 = vst [vmem:[%s2810_s23 + $0xc5] sm:$0x1] %v1327_v20  ;;  %v1472_v20 = vrot.slane %v1455_v9, 7 }
 0x170   : > { %1358 = vst [vmem:[%s2810_s23 + $0xd5] sm:$0x1] %v1328_v21  ;;  %v1512_v21 = vrot.slane %v1456_v18, 1 }
 0x171   : > { %1359 = vst [vmem:[%s2810_s23 + $0xe5] sm:$0x1] %v1329_v23  ;;  %v1571_v23 = vpop.f32.mrf.mxu2 }
 0x172   : > { %1360 = vst [vmem:[%s2810_s23 + $0xf5] sm:$0x1] %v1330_v25  ;;  %v1514_v25 = vrot.slane %v1456_v18, 3  ;;  %v1597_v27 = vmul.f32 %v1591_v48, %v1571_v23 }
 0x173   : > { %1399 = vst [vmem:[%s2817_s29 + $0x85] sm:$0x1] %v1314_v22  ;;  %v1513_v22 = vrot.slane %v1456_v18, 2 }
 0x174   : > { %1400 = vst [vmem:[%s2817_s29 + $0x95] sm:$0x1] %v1370_v26  ;;  %v1516_v26 = vrot.slane %v1456_v18, 5  ;;  %v1609_v31 = vrot.slane %v1597_v27, 2  ;;  %v1613_v37 = vrot.slane %v1597_v27, 6 }
 0x175   : > { %1401 = vst [vmem:[%s2817_s29 + $0xa5] sm:$0x1] %v1371_v28  ;;  %v1517_v28 = vrot.slane %v1456_v18, 6 }
 0x176   : > { %1402 = vst [vmem:[%s2817_s29 + $0xb5] sm:$0x1] %v1372_v29  ;;  %v1518_v29 = vrot.slane %v1456_v18, 7 }
 0x177   : > { %1403 = vst [vmem:[%s2817_s29 + $0xc5] sm:$0x1] %v1373_v30  ;;  %v1608_v30 = vrot.slane %v1597_v27, 1 }
 0x178   : > { %1404 = vst [vmem:[%s2817_s29 + $0xd5] sm:$0x1] %v1374_v32  ;;  %v1585_v32 = vpop.f32.mrf.mxu3 }
 0x179   : > { %1405 = vst [vmem:[%s2817_s29 + $0xe5] sm:$0x1] %v1375_v34  ;;  %v1611_v34 = vrot.slane %v1597_v27, 4 }
 0x17a   : > { %1406 = vst [vmem:[%s2817_s29 + $0xf5] sm:$0x1] %v1376_v35  ;;  %v1612_v35 = vrot.slane %v1597_v27, 5 }
 0x17b   : > { %1487 = vst [vmem:[%s2810_s23 + $0x6] sm:$0x1] %v1453_v33  ;;  %v1610_v33 = vrot.slane %v1597_v27, 3 }
 0x17c   : > { %1488 = vst [vmem:[%s2810_s23 + $0x16] sm:$0x1] %v1459_v36  ;;  %v1598_v36 = vmul.f32 %v1592_v58, %v1585_v32 }
 0x17d   : > { %1489 = vst [vmem:[%s2810_s23 + $0x26] sm:$0x1] %v1460_v38  ;;  %v3176_v38 = vld [vmem:[%s3389_s5 + $0x4] ss:$8 sm:$0x3] }
 0x17e   : > { %1490 = vst [vmem:[%s2810_s23 + $0x36] sm:$0x1] %v1461_v39  ;;  %v1614_v39 = vrot.slane %v1597_v27, 7  ;;  %v1733_v41 = vperm.slane %v3176_v38, 0  ;;  %v1659_v48 = vrot.slane %v1598_v36, 6 }
 0x17f   : > { %1491 = vst [vmem:[%s2810_s23 + $0x46] sm:$0x1] %v1462_v40  ;;  %v1654_v40 = vrot.slane %v1598_v36, 1 }
 0x180   : > { %1492 = vst [vmem:[%s2810_s23 + $0x56] sm:$0x1] %v1463_v42  ;;  %v1655_v42 = vrot.slane %v1598_v36, 2 }
 0x181   : > { %1493 = vst [vmem:[%s2810_s23 + $0x66] sm:$0x1] %v1464_v44  ;;  %v1657_v44 = vrot.slane %v1598_v36, 4 }
 0x182   : > { %1494 = vst [vmem:[%s2810_s23 + $0x76] sm:$0x1] %v1465_v46  ;;  %v1658_v46 = vrot.slane %v1598_v36, 5 }
 0x183   : > { %1533 = vst [vmem:[%s2817_s29 + $0x6] sm:$0x1] %v1454_v43  ;;  %v1656_v43 = vrot.slane %v1598_v36, 3 }
 0x184   : > { %1534 = vst [vmem:[%s2817_s29 + $0x16] sm:$0x1] %v1505_v47  ;;  %v1737_v47 = vmul.f32 %v1733_v41, %v1711_v45 }
 0x185   : > { %1535 = vst [vmem:[%s2817_s29 + $0x26] sm:$0x1] %v1506_v49  ;;  %v1660_v49 = vrot.slane %v1598_v36, 7 }
 0x186   : > { %1536 = vst [vmem:[%s2817_s29 + $0x36] sm:$0x1] %v1507_v51  ;;  %v1743_v50 = vrot.slane %v1737_v47, 1  ;;  %v1734_v51 = vperm.slane %v3176_v38, 1  ;;  %v1748_v58 = vrot.slane %v1737_v47, 6  ;;  %v1749_v61 = vrot.slane %v1737_v47, 7 }
 0x187   : > { %1537 = vst [vmem:[%s2817_s29 + $0x46] sm:$0x1] %v1508_v52  ;;  %v1744_v52 = vrot.slane %v1737_v47, 2 }
 0x188   : > { %1538 = vst [vmem:[%s2817_s29 + $0x56] sm:$0x1] %v1509_v53  ;;  %v1745_v53 = vrot.slane %v1737_v47, 3 }
 0x189   : > { %1539 = vst [vmem:[%s2817_s29 + $0x66] sm:$0x1] %v1510_v55  ;;  %v1725_v55 = vpop.f32.mrf.mxu1 }
 0x18a   : > { %1540 = vst [vmem:[%s2817_s29 + $0x76] sm:$0x1] %v1511_v56  ;;  %v1747_v56 = vrot.slane %v1737_v47, 5 }
 0x18b   : > { %1629 = vst [vmem:[%s2810_s23 + $0x7] sm:$0x1] %v1595_v54  ;;  %v1746_v54 = vrot.slane %v1737_v47, 4 }
 0x18c   : > { %1630 = vst [vmem:[%s2810_s23 + $0x17] sm:$0x1] %v1601_v57  ;;  %v1738_v57 = vmul.f32 %v1734_v51, %v1725_v55 }
 0x18d   : > { %1631 = vst [vmem:[%s2810_s23 + $0x27] sm:$0x1] %v1602_v59  ;;  %v3203_v59 = vld [vmem:[%s3389_s5 + $0x5] ss:$8 sm:$0x3] }
 0x18e   : > { %1632 = vst [vmem:[%s2810_s23 + $0x37] sm:$0x1] %v1603_v60  ;;  %v1789_v60 = vrot.slane %v1738_v57, 1  ;;  %v1794_v5 = vrot.slane %v1738_v57, 6 }
 0x18f   : > { %1633 = vst [vmem:[%s2810_s23 + $0x47] sm:$0x1] %v1604_v62  ;;  %v1875_v62 = vperm.slane %v3203_v59, 0 }
 0x190   : > { %1634 = vst [vmem:[%s2810_s23 + $0x57] sm:$0x1] %v1605_v63  ;;  %v1790_v63 = vrot.slane %v1738_v57, 2 }
 0x191   : > { %1635 = vst [vmem:[%s2810_s23 + $0x67] sm:$0x1] %v1606_v1  ;;  %v1791_v1 = vrot.slane %v1738_v57, 3 }
 0x192   : > { %1636 = vst [vmem:[%s2810_s23 + $0x77] sm:$0x1] %v1607_v2  ;;  %v1792_v2 = vrot.slane %v1738_v57, 4 }
 0x193   : > { %1675 = vst [vmem:[%s2817_s29 + $0x7] sm:$0x1] %v1596_v0  ;;  %v1853_v0 = vpop.f32.mrf.mxu2 }
 0x194   : > { %1676 = vst [vmem:[%s2817_s29 + $0x17] sm:$0x1] %v1647_v3  ;;  %v1793_v3 = vrot.slane %v1738_v57, 5 }
 0x195   : > { %1677 = vst [vmem:[%s2817_s29 + $0x27] sm:$0x1] %v1648_v4  ;;  %v1879_v4 = vmul.f32 %v1875_v62, %v1853_v0 }
 0x196   : > { %1678 = vst [vmem:[%s2817_s29 + $0x37] sm:$0x1] %v1649_v6  ;;  %v1795_v6 = vrot.slane %v1738_v57, 7 }
 0x197   : > { %1679 = vst [vmem:[%s2817_s29 + $0x47] sm:$0x1] %v1650_v7  ;;  %v1885_v7 = vrot.slane %v1879_v4, 1 }
 0x198   : > { %1680 = vst [vmem:[%s2817_s29 + $0x57] sm:$0x1] %v1651_v8  ;;  %v1876_v8 = vperm.slane %v3203_v59, 1 }
 0x199   : > { %1681 = vst [vmem:[%s2817_s29 + $0x67] sm:$0x1] %v1652_v11  ;;  %v1867_v11 = vpop.f32.mrf.mxu3 }
 0x19a   : > { %1682 = vst [vmem:[%s2817_s29 + $0x77] sm:$0x1] %v1653_v10  ;;  %v1887_v10 = vrot.slane %v1879_v4, 3  ;;  %v1880_v14 = vmul.f32 %v1876_v8, %v1867_v11 }
 0x19b   : > { %1495 = vst [vmem:[%s2810_s23 + $0x86] sm:$0x1] %v1455_v9  ;;  %v1886_v9 = vrot.slane %v1879_v4, 2 }
 0x19c   : > { %1496 = vst [vmem:[%s2810_s23 + $0x96] sm:$0x1] %v1466_v12  ;;  %v1888_v12 = vrot.slane %v1879_v4, 4 }
 0x19d   : > { %1497 = vst [vmem:[%s2810_s23 + $0xa6] sm:$0x1] %v1467_v13  ;;  %v1889_v13 = vrot.slane %v1879_v4, 5 }
 0x19e   : > { %1498 = vst [vmem:[%s2810_s23 + $0xb6] sm:$0x1] %v1468_v15  ;;  %v1890_v15 = vrot.slane %v1879_v4, 6 }
 0x19f   : > { %1499 = vst [vmem:[%s2810_s23 + $0xc6] sm:$0x1] %v1469_v16  ;;  %v1891_v16 = vrot.slane %v1879_v4, 7 }
 0x1a0   : > { %1500 = vst [vmem:[%s2810_s23 + $0xd6] sm:$0x1] %v1470_v17  ;;  %v1931_v17 = vrot.slane %v1880_v14, 1 }
 0x1a1   : > { %1501 = vst [vmem:[%s2810_s23 + $0xe6] sm:$0x1] %v1471_v19  ;;  %v1713_v19 = vpop.f32.mrf.mxu0 }
 0x1a2   : > { %1502 = vst [vmem:[%s2810_s23 + $0xf6] sm:$0x1] %v1472_v20  ;;  %v1933_v20 = vrot.slane %v1880_v14, 3  ;;  %v1739_v23 = vmul.f32 %v1733_v41, %v1713_v19 }
 0x1a3   : > { %1541 = vst [vmem:[%s2817_s29 + $0x86] sm:$0x1] %v1456_v18  ;;  %v1932_v18 = vrot.slane %v1880_v14, 2 }
 0x1a4   : > { %1542 = vst [vmem:[%s2817_s29 + $0x96] sm:$0x1] %v1512_v21  ;;  %v1934_v21 = vrot.slane %v1880_v14, 4 }
 0x1a5   : > { %1543 = vst [vmem:[%s2817_s29 + $0xa6] sm:$0x1] %v1513_v22  ;;  %v1935_v22 = vrot.slane %v1880_v14, 5 }
 0x1a6   : > { %1544 = vst [vmem:[%s2817_s29 + $0xb6] sm:$0x1] %v1514_v25  ;;  %v1936_v25 = vrot.slane %v1880_v14, 6 }
 0x1a7   : > { %1545 = vst [vmem:[%s2817_s29 + $0xc6] sm:$0x1] %v1515_v24  ;;  %v1937_v24 = vrot.slane %v1880_v14, 7 }
 0x1a8   : > { %1546 = vst [vmem:[%s2817_s29 + $0xd6] sm:$0x1] %v1516_v26  ;;  %v1750_v26 = vrot.slane %v1739_v23, 1 }
 0x1a9   : > { %1547 = vst [vmem:[%s2817_s29 + $0xe6] sm:$0x1] %v1517_v28  ;;  %v1727_v28 = vpop.f32.mrf.mxu1  ;;  %v1995_v59 = vpop.f32.mrf.mxu0 }
 0x1aa   : > { %1548 = vst [vmem:[%s2817_s29 + $0xf6] sm:$0x1] %v1518_v29  ;;  %v1752_v29 = vrot.slane %v1739_v23, 3  ;;  %v1740_v32 = vmul.f32 %v1734_v51, %v1727_v28 }
 0x1ab   : > { %1637 = vst [vmem:[%s2810_s23 + $0x87] sm:$0x1] %v1597_v27  ;;  %v1751_v27 = vrot.slane %v1739_v23, 2 }
 0x1ac   : > { %1638 = vst [vmem:[%s2810_s23 + $0x97] sm:$0x1] %v1608_v30  ;;  %v1753_v30 = vrot.slane %v1739_v23, 4  ;;  %v1799_v38 = vrot.slane %v1740_v32, 4 }
 0x1ad   : > { %1639 = vst [vmem:[%s2810_s23 + $0xa7] sm:$0x1] %v1609_v31  ;;  %v1754_v31 = vrot.slane %v1739_v23, 5 }
 0x1ae   : > { %1640 = vst [vmem:[%s2810_s23 + $0xb7] sm:$0x1] %v1610_v33  ;;  %v1755_v33 = vrot.slane %v1739_v23, 6 }
 0x1af   : > { %1641 = vst [vmem:[%s2810_s23 + $0xc7] sm:$0x1] %v1611_v34  ;;  %v1756_v34 = vrot.slane %v1739_v23, 7 }
 0x1b0   : > { %1642 = vst [vmem:[%s2810_s23 + $0xd7] sm:$0x1] %v1612_v35  ;;  %v1796_v35 = vrot.slane %v1740_v32, 1 }
 0x1b1   : > { %1643 = vst [vmem:[%s2810_s23 + $0xe7] sm:$0x1] %v1613_v37  ;;  %v1855_v37 = vpop.f32.mrf.mxu2 }
 0x1b2   : > { %1644 = vst [vmem:[%s2810_s23 + $0xf7] sm:$0x1] %v1614_v39  ;;  %v1798_v39 = vrot.slane %v1740_v32, 3  ;;  %v1881_v41 = vmul.f32 %v1875_v62, %v1855_v37 }
 0x1b3   : > { %1683 = vst [vmem:[%s2817_s29 + $0x87] sm:$0x1] %v1598_v36  ;;  %v1797_v36 = vrot.slane %v1740_v32, 2 }
 0x1b4   : > { %1684 = vst [vmem:[%s2817_s29 + $0x97] sm:$0x1] %v1654_v40  ;;  %v1800_v40 = vrot.slane %v1740_v32, 5  ;;  %v1893_v45 = vrot.slane %v1881_v41, 2  ;;  %v1897_v51 = vrot.slane %v1881_v41, 6 }
 0x1b5   : > { %1685 = vst [vmem:[%s2817_s29 + $0xa7] sm:$0x1] %v1655_v42  ;;  %v1801_v42 = vrot.slane %v1740_v32, 6 }
 0x1b6   : > { %1686 = vst [vmem:[%s2817_s29 + $0xb7] sm:$0x1] %v1656_v43  ;;  %v1802_v43 = vrot.slane %v1740_v32, 7 }
 0x1b7   : > { %1687 = vst [vmem:[%s2817_s29 + $0xc7] sm:$0x1] %v1657_v44  ;;  %v1892_v44 = vrot.slane %v1881_v41, 1 }
 0x1b8   : > { %1688 = vst [vmem:[%s2817_s29 + $0xd7] sm:$0x1] %v1658_v46  ;;  %v1869_v46 = vpop.f32.mrf.mxu3 }
 0x1b9   : > { %1689 = vst [vmem:[%s2817_s29 + $0xe7] sm:$0x1] %v1659_v48  ;;  %v1895_v48 = vrot.slane %v1881_v41, 4 }
 0x1ba   : > { %1690 = vst [vmem:[%s2817_s29 + $0xf7] sm:$0x1] %v1660_v49  ;;  %v1896_v49 = vrot.slane %v1881_v41, 5 }
 0x1bb   : > { %1771 = vst [vmem:[%s2810_s23 + $0x8] sm:$0x1] %v1737_v47  ;;  %v1894_v47 = vrot.slane %v1881_v41, 3 }
 0x1bc   : > { %1772 = vst [vmem:[%s2810_s23 + $0x18] sm:$0x1] %v1743_v50  ;;  %v1882_v50 = vmul.f32 %v1876_v8, %v1869_v46 }
 0x1bd   : > { %1773 = vst [vmem:[%s2810_s23 + $0x28] sm:$0x1] %v1744_v52  ;;  %v3270_v52 = vld [vmem:[%s3389_s5 + $0x6] ss:$8 sm:$0x3] }
 0x1be   : > { %1774 = vst [vmem:[%s2810_s23 + $0x38] sm:$0x1] %v1745_v53  ;;  %v1898_v53 = vrot.slane %v1881_v41, 7  ;;  %v2017_v55 = vperm.slane %v3270_v52, 0  ;;  %v1943_v62 = vrot.slane %v1882_v50, 6 }
 0x1bf   : > { %1775 = vst [vmem:[%s2810_s23 + $0x48] sm:$0x1] %v1746_v54  ;;  %v1938_v54 = vrot.slane %v1882_v50, 1 }
 0x1c0   : > { %1776 = vst [vmem:[%s2810_s23 + $0x58] sm:$0x1] %v1747_v56  ;;  %v1939_v56 = vrot.slane %v1882_v50, 2 }
 0x1c1   : > { %1777 = vst [vmem:[%s2810_s23 + $0x68] sm:$0x1] %v1748_v58  ;;  %v1941_v58 = vrot.slane %v1882_v50, 4 }
 0x1c2   : > { %1778 = vst [vmem:[%s2810_s23 + $0x78] sm:$0x1] %v1749_v61  ;;  %v1942_v61 = vrot.slane %v1882_v50, 5 }
 0x1c3   : > { %1817 = vst [vmem:[%s2817_s29 + $0x8] sm:$0x1] %v1738_v57  ;;  %v1940_v57 = vrot.slane %v1882_v50, 3 }
 0x1c4   : > { %1818 = vst [vmem:[%s2817_s29 + $0x18] sm:$0x1] %v1789_v60  ;;  %v2021_v60 = vmul.f32 %v2017_v55, %v1995_v59 }
 0x1c5   : > { %1819 = vst [vmem:[%s2817_s29 + $0x28] sm:$0x1] %v1790_v63  ;;  %v1944_v63 = vrot.slane %v1882_v50, 7 }
 0x1c6   : > { %1820 = vst [vmem:[%s2817_s29 + $0x38] sm:$0x1] %v1791_v1  ;;  %v2027_v0 = vrot.slane %v2021_v60, 1  ;;  %v2018_v1 = vperm.slane %v3270_v52, 1  ;;  %v2032_v8 = vrot.slane %v2021_v60, 6  ;;  %v2033_v11 = vrot.slane %v2021_v60, 7 }
 0x1c7   : > { %1821 = vst [vmem:[%s2817_s29 + $0x48] sm:$0x1] %v1792_v2  ;;  %v2028_v2 = vrot.slane %v2021_v60, 2 }
 0x1c8   : > { %1822 = vst [vmem:[%s2817_s29 + $0x58] sm:$0x1] %v1793_v3  ;;  %v2029_v3 = vrot.slane %v2021_v60, 3 }
 0x1c9   : > { %1823 = vst [vmem:[%s2817_s29 + $0x68] sm:$0x1] %v1794_v5  ;;  %v2009_v5 = vpop.f32.mrf.mxu1 }
 0x1ca   : > { %1824 = vst [vmem:[%s2817_s29 + $0x78] sm:$0x1] %v1795_v6  ;;  %v2031_v6 = vrot.slane %v2021_v60, 5 }
 0x1cb   : > { %1913 = vst [vmem:[%s2810_s23 + $0x9] sm:$0x1] %v1879_v4  ;;  %v2030_v4 = vrot.slane %v2021_v60, 4 }
 0x1cc   : > { %1914 = vst [vmem:[%s2810_s23 + $0x19] sm:$0x1] %v1885_v7  ;;  %v2022_v7 = vmul.f32 %v2018_v1, %v2009_v5 }
 0x1cd   : > { %1915 = vst [vmem:[%s2810_s23 + $0x29] sm:$0x1] %v1886_v9  ;;  %v3297_v9 = vld [vmem:[%s3389_s5 + $0x7] ss:$8 sm:$0x3] }
 0x1ce   : > { %1916 = vst [vmem:[%s2810_s23 + $0x39] sm:$0x1] %v1887_v10  ;;  %v2073_v10 = vrot.slane %v2022_v7, 1  ;;  %v2078_v19 = vrot.slane %v2022_v7, 6 }
 0x1cf   : > { %1917 = vst [vmem:[%s2810_s23 + $0x49] sm:$0x1] %v1888_v12  ;;  %v2159_v12 = vperm.slane %v3297_v9, 0 }
 0x1d0   : > { %1918 = vst [vmem:[%s2810_s23 + $0x59] sm:$0x1] %v1889_v13  ;;  %v2074_v13 = vrot.slane %v2022_v7, 2 }
 0x1d1   : > { %1919 = vst [vmem:[%s2810_s23 + $0x69] sm:$0x1] %v1890_v15  ;;  %v2075_v15 = vrot.slane %v2022_v7, 3 }
 0x1d2   : > { %1920 = vst [vmem:[%s2810_s23 + $0x79] sm:$0x1] %v1891_v16  ;;  %v2076_v16 = vrot.slane %v2022_v7, 4 }
 0x1d3   : > { %1959 = vst [vmem:[%s2817_s29 + $0x9] sm:$0x1] %v1880_v14  ;;  %v2137_v14 = vpop.f32.mrf.mxu2 }
 0x1d4   : > { %1960 = vst [vmem:[%s2817_s29 + $0x19] sm:$0x1] %v1931_v17  ;;  %v2077_v17 = vrot.slane %v2022_v7, 5 }
 0x1d5   : > { %1961 = vst [vmem:[%s2817_s29 + $0x29] sm:$0x1] %v1932_v18  ;;  %v2163_v18 = vmul.f32 %v2159_v12, %v2137_v14 }
 0x1d6   : > { %1962 = vst [vmem:[%s2817_s29 + $0x39] sm:$0x1] %v1933_v20  ;;  %v2079_v20 = vrot.slane %v2022_v7, 7 }
 0x1d7   : > { %1963 = vst [vmem:[%s2817_s29 + $0x49] sm:$0x1] %v1934_v21  ;;  %v2169_v21 = vrot.slane %v2163_v18, 1 }
 0x1d8   : > { %1964 = vst [vmem:[%s2817_s29 + $0x59] sm:$0x1] %v1935_v22  ;;  %v2160_v22 = vperm.slane %v3297_v9, 1 }
 0x1d9   : > { %1965 = vst [vmem:[%s2817_s29 + $0x69] sm:$0x1] %v1936_v25  ;;  %v2151_v25 = vpop.f32.mrf.mxu3 }
 0x1da   : > { %1966 = vst [vmem:[%s2817_s29 + $0x79] sm:$0x1] %v1937_v24  ;;  %v2171_v24 = vrot.slane %v2163_v18, 3  ;;  %v2164_v28 = vmul.f32 %v2160_v22, %v2151_v25 }
 0x1db   : > { %1779 = vst [vmem:[%s2810_s23 + $0x88] sm:$0x1] %v1739_v23  ;;  %v2170_v23 = vrot.slane %v2163_v18, 2 }
 0x1dc   : > { %1780 = vst [vmem:[%s2810_s23 + $0x98] sm:$0x1] %v1750_v26  ;;  %v2172_v26 = vrot.slane %v2163_v18, 4 }
 0x1dd   : > { %1781 = vst [vmem:[%s2810_s23 + $0xa8] sm:$0x1] %v1751_v27  ;;  %v2173_v27 = vrot.slane %v2163_v18, 5 }
 0x1de   : > { %1782 = vst [vmem:[%s2810_s23 + $0xb8] sm:$0x1] %v1752_v29  ;;  %v2174_v29 = vrot.slane %v2163_v18, 6 }
 0x1df   : > { %1783 = vst [vmem:[%s2810_s23 + $0xc8] sm:$0x1] %v1753_v30  ;;  %v2175_v30 = vrot.slane %v2163_v18, 7 }
 0x1e0   : > { %1784 = vst [vmem:[%s2810_s23 + $0xd8] sm:$0x1] %v1754_v31  ;;  %v2215_v31 = vrot.slane %v2164_v28, 1 }
 0x1e1   : > { %1785 = vst [vmem:[%s2810_s23 + $0xe8] sm:$0x1] %v1755_v33  ;;  %v1997_v33 = vpop.f32.mrf.mxu0 }
 0x1e2   : > { %1786 = vst [vmem:[%s2810_s23 + $0xf8] sm:$0x1] %v1756_v34  ;;  %v2217_v34 = vrot.slane %v2164_v28, 3  ;;  %v2023_v37 = vmul.f32 %v2017_v55, %v1997_v33 }
 0x1e3   : > { %1825 = vst [vmem:[%s2817_s29 + $0x88] sm:$0x1] %v1740_v32  ;;  %v2216_v32 = vrot.slane %v2164_v28, 2 }
 0x1e4   : > { %1826 = vst [vmem:[%s2817_s29 + $0x98] sm:$0x1] %v1796_v35  ;;  %v2218_v35 = vrot.slane %v2164_v28, 4 }
 0x1e5   : > { %1827 = vst [vmem:[%s2817_s29 + $0xa8] sm:$0x1] %v1797_v36  ;;  %v2219_v36 = vrot.slane %v2164_v28, 5 }
 0x1e6   : > { %1828 = vst [vmem:[%s2817_s29 + $0xb8] sm:$0x1] %v1798_v39  ;;  %v2220_v39 = vrot.slane %v2164_v28, 6 }
 0x1e7   : > { %1829 = vst [vmem:[%s2817_s29 + $0xc8] sm:$0x1] %v1799_v38  ;;  %v2221_v38 = vrot.slane %v2164_v28, 7 }
 0x1e8   : > { %1830 = vst [vmem:[%s2817_s29 + $0xd8] sm:$0x1] %v1800_v40  ;;  %v2034_v40 = vrot.slane %v2023_v37, 1 }
 0x1e9   : > { %1831 = vst [vmem:[%s2817_s29 + $0xe8] sm:$0x1] %v1801_v42  ;;  %v2011_v42 = vpop.f32.mrf.mxu1 }
 0x1ea   : > { %1832 = vst [vmem:[%s2817_s29 + $0xf8] sm:$0x1] %v1802_v43  ;;  %v2036_v43 = vrot.slane %v2023_v37, 3  ;;  %v2024_v46 = vmul.f32 %v2018_v1, %v2011_v42 }
 0x1eb   : > { %1921 = vst [vmem:[%s2810_s23 + $0x89] sm:$0x1] %v1881_v41  ;;  %v2035_v41 = vrot.slane %v2023_v37, 2 }
 0x1ec   : > { %1922 = vst [vmem:[%s2810_s23 + $0x99] sm:$0x1] %v1892_v44  ;;  %v2037_v44 = vrot.slane %v2023_v37, 4  ;;  %v2083_v52 = vrot.slane %v2024_v46, 4 }
 0x1ed   : > { %1923 = vst [vmem:[%s2810_s23 + $0xa9] sm:$0x1] %v1893_v45  ;;  %v2038_v45 = vrot.slane %v2023_v37, 5 }
 0x1ee   : > { %1924 = vst [vmem:[%s2810_s23 + $0xb9] sm:$0x1] %v1894_v47  ;;  %v2039_v47 = vrot.slane %v2023_v37, 6 }
 0x1ef   : > { %1925 = vst [vmem:[%s2810_s23 + $0xc9] sm:$0x1] %v1895_v48  ;;  %v2040_v48 = vrot.slane %v2023_v37, 7 }
 0x1f0   : > { %1926 = vst [vmem:[%s2810_s23 + $0xd9] sm:$0x1] %v1896_v49  ;;  %v2080_v49 = vrot.slane %v2024_v46, 1 }
 0x1f1   : > { %1927 = vst [vmem:[%s2810_s23 + $0xe9] sm:$0x1] %v1897_v51  ;;  %v2139_v51 = vpop.f32.mrf.mxu2 }
 0x1f2   : > { %1928 = vst [vmem:[%s2810_s23 + $0xf9] sm:$0x1] %v1898_v53  ;;  %v2082_v53 = vrot.slane %v2024_v46, 3  ;;  %v2165_v55 = vmul.f32 %v2159_v12, %v2139_v51 }
 0x1f3   : > { %1967 = vst [vmem:[%s2817_s29 + $0x89] sm:$0x1] %v1882_v50  ;;  %v2081_v50 = vrot.slane %v2024_v46, 2 }
 0x1f4   : > { %1968 = vst [vmem:[%s2817_s29 + $0x99] sm:$0x1] %v1938_v54  ;;  %v2084_v54 = vrot.slane %v2024_v46, 5  ;;  %v2177_v59 = vrot.slane %v2165_v55, 2  ;;  %v2181_v1 = vrot.slane %v2165_v55, 6 }
 0x1f5   : > { %1969 = vst [vmem:[%s2817_s29 + $0xa9] sm:$0x1] %v1939_v56  ;;  %v2085_v56 = vrot.slane %v2024_v46, 6 }
 0x1f6   : > { %1970 = vst [vmem:[%s2817_s29 + $0xb9] sm:$0x1] %v1940_v57  ;;  %v2086_v57 = vrot.slane %v2024_v46, 7 }
 0x1f7   : > { %1971 = vst [vmem:[%s2817_s29 + $0xc9] sm:$0x1] %v1941_v58  ;;  %v2176_v58 = vrot.slane %v2165_v55, 1 }
 0x1f8   : > { %1972 = vst [vmem:[%s2817_s29 + $0xd9] sm:$0x1] %v1942_v61  ;;  %v2153_v61 = vpop.f32.mrf.mxu3 }
 0x1f9   : > { %1973 = vst [vmem:[%s2817_s29 + $0xe9] sm:$0x1] %v1943_v62  ;;  %v2179_v62 = vrot.slane %v2165_v55, 4 }
 0x1fa   : > { %1974 = vst [vmem:[%s2817_s29 + $0xf9] sm:$0x1] %v1944_v63  ;;  %v2180_v63 = vrot.slane %v2165_v55, 5 }
 0x1fb   : > { %2055 = vst [vmem:[%s2810_s23 + $0xa] sm:$0x1] %v2021_v60  ;;  %v2178_v60 = vrot.slane %v2165_v55, 3 }
 0x1fc   : > { %2056 = vst [vmem:[%s2810_s23 + $0x1a] sm:$0x1] %v2027_v0  ;;  %v2166_v0 = vmul.f32 %v2160_v22, %v2153_v61 }
 0x1fd   : > { %2057 = vst [vmem:[%s2810_s23 + $0x2a] sm:$0x1] %v2028_v2  ;;  %v2182_v2 = vrot.slane %v2165_v55, 7 }
 0x1fe   : > { %2058 = vst [vmem:[%s2810_s23 + $0x3a] sm:$0x1] %v2029_v3  ;;  %v2222_v3 = vrot.slane %v2166_v0, 1  ;;  %v2224_v5 = vrot.slane %v2166_v0, 3  ;;  %v2228_v9 = vrot.slane %v2166_v0, 7 }
 0x1ff   : > { %2059 = vst [vmem:[%s2810_s23 + $0x4a] sm:$0x1] %v2030_v4  ;;  %v2223_v4 = vrot.slane %v2166_v0, 2 }
 0x200   : > { %2060 = vst [vmem:[%s2810_s23 + $0x5a] sm:$0x1] %v2031_v6  ;;  %v2225_v6 = vrot.slane %v2166_v0, 4 }
 0x201   : > { %2061 = vst [vmem:[%s2810_s23 + $0x6a] sm:$0x1] %v2032_v8  ;;  %v2227_v8 = vrot.slane %v2166_v0, 6 }
 0x202   : > { %2062 = vst [vmem:[%s2810_s23 + $0x7a] sm:$0x1] %v2033_v11 }
 0x203   : > { %2101 = vst [vmem:[%s2817_s29 + $0xa] sm:$0x1] %v2022_v7  ;;  %v2226_v7 = vrot.slane %v2166_v0, 5 }
 0x204   : > { %2102 = vst [vmem:[%s2817_s29 + $0x1a] sm:$0x1] %v2073_v10 }
 0x205   : > { %2103 = vst [vmem:[%s2817_s29 + $0x2a] sm:$0x1] %v2074_v13 }
 0x206   : > { %2104 = vst [vmem:[%s2817_s29 + $0x3a] sm:$0x1] %v2075_v15 }
 0x207   : > { %2105 = vst [vmem:[%s2817_s29 + $0x4a] sm:$0x1] %v2076_v16 }
 0x208   : > { %2106 = vst [vmem:[%s2817_s29 + $0x5a] sm:$0x1] %v2077_v17 }
 0x209   : > { %2107 = vst [vmem:[%s2817_s29 + $0x6a] sm:$0x1] %v2078_v19 }
 0x20a   : > { %2108 = vst [vmem:[%s2817_s29 + $0x7a] sm:$0x1] %v2079_v20 }
 0x20b   : > { %2197 = vst [vmem:[%s2810_s23 + $0xb] sm:$0x1] %v2163_v18 }
 0x20c   : > { %2198 = vst [vmem:[%s2810_s23 + $0x1b] sm:$0x1] %v2169_v21 }
 0x20d   : > { %2199 = vst [vmem:[%s2810_s23 + $0x2b] sm:$0x1] %v2170_v23 }
 0x20e   : > { %2200 = vst [vmem:[%s2810_s23 + $0x3b] sm:$0x1] %v2171_v24 }
 0x20f   : > { %2201 = vst [vmem:[%s2810_s23 + $0x4b] sm:$0x1] %v2172_v26 }
 0x210   : > { %2202 = vst [vmem:[%s2810_s23 + $0x5b] sm:$0x1] %v2173_v27 }
 0x211   : > { %2203 = vst [vmem:[%s2810_s23 + $0x6b] sm:$0x1] %v2174_v29 }
 0x212   : > { %2204 = vst [vmem:[%s2810_s23 + $0x7b] sm:$0x1] %v2175_v30 }
 0x213   : > { %2243 = vst [vmem:[%s2817_s29 + $0xb] sm:$0x1] %v2164_v28 }
 0x214   : > { %2244 = vst [vmem:[%s2817_s29 + $0x1b] sm:$0x1] %v2215_v31 }
 0x215   : > { %2245 = vst [vmem:[%s2817_s29 + $0x2b] sm:$0x1] %v2216_v32 }
 0x216   : > { %2246 = vst [vmem:[%s2817_s29 + $0x3b] sm:$0x1] %v2217_v34 }
 0x217   : > { %2247 = vst [vmem:[%s2817_s29 + $0x4b] sm:$0x1] %v2218_v35 }
 0x218   : > { %2248 = vst [vmem:[%s2817_s29 + $0x5b] sm:$0x1] %v2219_v36 }
 0x219   : > { %2249 = vst [vmem:[%s2817_s29 + $0x6b] sm:$0x1] %v2220_v39 }
 0x21a   : > { %2250 = vst [vmem:[%s2817_s29 + $0x7b] sm:$0x1] %v2221_v38 }
 0x21b   : > { %2063 = vst [vmem:[%s2810_s23 + $0x8a] sm:$0x1] %v2023_v37 }
 0x21c   : > { %2064 = vst [vmem:[%s2810_s23 + $0x9a] sm:$0x1] %v2034_v40 }
 0x21d   : > { %2065 = vst [vmem:[%s2810_s23 + $0xaa] sm:$0x1] %v2035_v41 }
 0x21e   : > { %2066 = vst [vmem:[%s2810_s23 + $0xba] sm:$0x1] %v2036_v43 }
 0x21f   : > { %2067 = vst [vmem:[%s2810_s23 + $0xca] sm:$0x1] %v2037_v44 }
 0x220   : > { %2068 = vst [vmem:[%s2810_s23 + $0xda] sm:$0x1] %v2038_v45 }
 0x221   : > { %2069 = vst [vmem:[%s2810_s23 + $0xea] sm:$0x1] %v2039_v47 }
 0x222   : > { %2070 = vst [vmem:[%s2810_s23 + $0xfa] sm:$0x1] %v2040_v48 }
 0x223   : > { %2109 = vst [vmem:[%s2817_s29 + $0x8a] sm:$0x1] %v2024_v46 }
 0x224   : > { %2110 = vst [vmem:[%s2817_s29 + $0x9a] sm:$0x1] %v2080_v49 }
 0x225   : > { %2111 = vst [vmem:[%s2817_s29 + $0xaa] sm:$0x1] %v2081_v50 }
 0x226   : > { %2112 = vst [vmem:[%s2817_s29 + $0xba] sm:$0x1] %v2082_v53 }
 0x227   : > { %2113 = vst [vmem:[%s2817_s29 + $0xca] sm:$0x1] %v2083_v52 }
 0x228   : > { %2114 = vst [vmem:[%s2817_s29 + $0xda] sm:$0x1] %v2084_v54 }
 0x229   : > { %2115 = vst [vmem:[%s2817_s29 + $0xea] sm:$0x1] %v2085_v56 }
 0x22a   : > { %2116 = vst [vmem:[%s2817_s29 + $0xfa] sm:$0x1] %v2086_v57 }
 0x22b   : > { %2205 = vst [vmem:[%s2810_s23 + $0x8b] sm:$0x1] %v2165_v55 }
 0x22c   : > { %2206 = vst [vmem:[%s2810_s23 + $0x9b] sm:$0x1] %v2176_v58 }
 0x22d   : > { %2207 = vst [vmem:[%s2810_s23 + $0xab] sm:$0x1] %v2177_v59 }
 0x22e   : > { %2208 = vst [vmem:[%s2810_s23 + $0xbb] sm:$0x1] %v2178_v60 }
 0x22f   : > { %2209 = vst [vmem:[%s2810_s23 + $0xcb] sm:$0x1] %v2179_v62 }
 0x230   : > { %2210 = vst [vmem:[%s2810_s23 + $0xdb] sm:$0x1] %v2180_v63 }
 0x231   : > { %2211 = vst [vmem:[%s2810_s23 + $0xeb] sm:$0x1] %v2181_v1 }
 0x232   : > { %2212 = vst [vmem:[%s2810_s23 + $0xfb] sm:$0x1] %v2182_v2 }
 0x233   : > { %2251 = vst [vmem:[%s2817_s29 + $0x8b] sm:$0x1] %v2166_v0 }
 0x234   : > { %2252 = vst [vmem:[%s2817_s29 + $0x9b] sm:$0x1] %v2222_v3 }
 0x235   : > { %2253 = vst [vmem:[%s2817_s29 + $0xab] sm:$0x1] %v2223_v4 }
 0x236   : > { %2254 = vst [vmem:[%s2817_s29 + $0xbb] sm:$0x1] %v2224_v5 }
 0x237   : > { %2255 = vst [vmem:[%s2817_s29 + $0xcb] sm:$0x1] %v2225_v6 }
 0x238   : > { %2256 = vst [vmem:[%s2817_s29 + $0xdb] sm:$0x1] %v2226_v7 }
 0x239   : > { %2257 = vst [vmem:[%s2817_s29 + $0xeb] sm:$0x1] %v2227_v8 }
 0x23a   : > { %2258 = vst [vmem:[%s2817_s29 + $0xfb] sm:$0x1] %v2228_v9 }
 0x23b PF: > { %p15_p9 = scmp.ge.s32.totalorder %s2671_s28, 4   ;;  %s3393_s24 = smov %s2608_s25 }
 0x23c   : > { %s3394_s25 = smov %s2680_s8  ;;  %s3395_s26 = smov %s2671_s28 }
 0x23d   :  { %17 = sbr.rel (!%p15_p9) target bundleno = 2 (0x2), region = 201 }

</bundles_post_ra>
